<compile_context>
chip_gen: v5e
topology: v5e:2x2
jax: 0.10.0
libtpu: 0.0.40
codegen_flags: <defaults>
</compile_context>

<pallas_src>
import functools

import jax
import jax.numpy as jnp
from jax import lax
from jax.experimental import pallas as pl
from jax.experimental.pallas import tpu as pltpu

SIM_THRESHOLD = 0.3
EPS = 1e-6

NUM_CATS = (35, 8, 33)     # categories / underaged_categories / animal_categories
NGROUPS = 3
NCAT_PAD = 64              # each category bank padded to 64 columns
NCAT_TOTAL = 256           # 3 banks packed + zero-padded to a lane-friendly 256

B = 2                      # demo batch
C, H, W = 4, 16, 16        # image NCHW
L = 8                      # token sequence length
V = 64                     # vocab size
E = 128                    # text embedding dim
D = 128                    # CLIP feature dim (lane-aligned)
F = C * H * W              # flattened image features (1024)

BT_MAX = 128               # batch tile for real batches (fills MXU M dim)
OUT_W = 128                # lane-dense output slab width


def _round_up(x, m):
    return ((x + m - 1) // m) * m


def clip_filter_kernel(img_ref, tok_ref, w_img_ref, w_txt_ref, cats_ref, out_ref):
    f32 = jnp.float32
    bt = img_ref.shape[0]

    # ---- encode_image: flatten -> linear (bf16 operands, f32 MXU accumulation)
    img_feat = jnp.dot(img_ref[...], w_img_ref[...],
                       preferred_element_type=f32)                       # [bt, D]

    # ---- encode_text (fused): one-hot token counts @ ((tok_embed @ w_txt)/L)
    tok = tok_ref[...]                                                   # [bt, L] i32
    v_iota = lax.broadcasted_iota(jnp.int32, (bt, V), 1)
    counts = jnp.zeros((bt, V), jnp.bfloat16)
    for l in range(L):                                                   # static unroll
        counts = counts + (v_iota == tok[:, l:l + 1]).astype(jnp.bfloat16)
    txt_feat = jnp.dot(counts, w_txt_ref[...],
                       preferred_element_type=f32)                       # [bt, D]

    # ---- torch.nn.CosineSimilarity(dim=1, eps=1e-6): rsqrt (EUP) not sqrt+div
    ssq_i = jnp.sum(img_feat * img_feat, axis=1, keepdims=True)          # [bt, 1]
    ssq_t = jnp.sum(txt_feat * txt_feat, axis=1, keepdims=True)
    dot_it = jnp.sum(img_feat * txt_feat, axis=1, keepdims=True)
    inv_i = lax.rsqrt(jnp.maximum(ssq_i, f32(EPS * EPS)))
    inv_t = lax.rsqrt(jnp.maximum(ssq_t, f32(EPS * EPS)))
    sim = dot_it * inv_i * inv_t                                         # [bt, 1]

    # ---- prob(): ONE fused logits matmul against all 3 pre-normalized banks.
    # (100x scale + softmax are monotone -> topk(2) of raw logits is identical)
    # TODO(synk): bf16 logits can swap near-tie top-2 indices vs an f32 torch ref.
    img_n = (img_feat * inv_i).astype(jnp.bfloat16)                      # [bt, D]
    logits = jnp.dot(img_n, cats_ref[...], preferred_element_type=f32)   # [bt, 256]

    col = lax.broadcasted_iota(jnp.int32, (bt, NCAT_TOTAL), 1)
    neg_inf = f32(-jnp.inf)
    big = jnp.int32(10 ** 9)

    # gate: top-2 indices if sim < threshold else zeros(3, 2)
    gate = (sim < f32(SIM_THRESHOLD)).astype(f32)                        # [bt, 1]

    # ---- single lane-dense output slab:
    #   lane 0 = sim, lanes 1..6 = (g0_t1, g0_t2, g1_t1, g1_t2, g2_t1, g2_t2)
    col_o = lax.broadcasted_iota(jnp.int32, (bt, OUT_W), 1)
    out = jnp.where(col_o == 0, sim, jnp.zeros((bt, OUT_W), f32))

    for g in range(NGROUPS):                                             # static unroll
        lo = g * NCAT_PAD
        # per-group validity mask directly on the fused logits (no concat)
        sel = jnp.where((col >= lo) & (col < lo + NUM_CATS[g]), logits, neg_inf)
        m1 = jnp.max(sel, axis=-1, keepdims=True)
        idx1 = jnp.min(jnp.where(sel == m1, col, big), axis=-1, keepdims=True)
        sel2 = jnp.where(col == idx1, neg_inf, sel)
        m2 = jnp.max(sel2, axis=-1, keepdims=True)
        idx2 = jnp.min(jnp.where(sel2 == m2, col, big), axis=-1, keepdims=True)
        i1 = (idx1 - lo).astype(f32) * gate                              # [bt, 1]
        i2 = (idx2 - lo).astype(f32) * gate
        out = jnp.where(col_o == 1 + 2 * g, i1, out)
        out = jnp.where(col_o == 2 + 2 * g, i2, out)

    out_ref[...] = out


def make_params(key):
    ks = jax.random.split(key, 6)
    w_img = 0.02 * jax.random.normal(ks[0], (F, D), jnp.float32)
    w_txt = 0.02 * jax.random.normal(ks[1], (E, D), jnp.float32)
    tok_embed = 0.02 * jax.random.normal(ks[2], (V, E), jnp.float32)

    # Category prompt features are fixed at __init__ in the reference module:
    # L2-normalize, pad each bank to 64 rows, pack ALL banks into one [D, 256]
    # bf16 matrix ONCE here -> single fused logits matmul in the kernel.
    banks = []
    for i, n in enumerate(NUM_CATS):
        bank = jax.random.normal(ks[3 + i], (n, D), jnp.float32)
        bank = bank / jnp.linalg.norm(bank, axis=-1, keepdims=True)
        banks.append(jnp.concatenate(
            [bank, jnp.zeros((NCAT_PAD - n, D), jnp.float32)], axis=0))  # [64, D]
    cats = jnp.concatenate(banks, axis=0)                                # [192, D]
    cats = jnp.concatenate(
        [cats, jnp.zeros((NCAT_TOTAL - NGROUPS * NCAT_PAD, D), jnp.float32)], axis=0)
    cats_T = cats.T.astype(jnp.bfloat16)                                 # [D, 256]

    # Fold token-embedding + mean-pool (1/L) + text projection:
    #   mean_l tok_embed[t_l] @ w_txt == counts @ ((tok_embed @ w_txt) / L)
    w_txt_eff = ((tok_embed @ w_txt) * (1.0 / L)).astype(jnp.bfloat16)   # [V, D]

    return dict(w_img=w_img.astype(jnp.bfloat16),                        # [F, D] bf16
                w_txt_eff=w_txt_eff, cats_T=cats_T)


def _resident_spec(shape, single_buffer):
    """Constant-index (grid-resident) weight spec; single-buffered if supported."""
    index_map = lambda i: (0,) * len(shape)
    if single_buffer:
        return pl.BlockSpec(shape, index_map, pipeline_mode=pl.Buffered(1))
    return pl.BlockSpec(shape, index_map)


@functools.partial(jax.jit, static_argnames=("bt", "single_buffer"))
def _forward_call(img_flat, tok, w_img, w_txt_eff, cats_T, *, bt, single_buffer):
    bp = img_flat.shape[0]
    grid_spec = pltpu.PrefetchScalarGridSpec(
        num_scalar_prefetch=0,
        grid=(bp // bt,),
        in_specs=[
            pl.BlockSpec((bt, F), lambda i: (i, 0)),                     # image tile
            pl.BlockSpec((bt, L), lambda i: (i, 0)),                     # token tile
            _resident_spec((F, D), single_buffer),                       # resident weights
            _resident_spec((V, D), single_buffer),
            _resident_spec((D, NCAT_TOTAL), single_buffer),              # fused cat banks
        ],
        out_specs=pl.BlockSpec((bt, OUT_W), lambda i: (i, 0)),
    )
    return pl.pallas_call(
        clip_filter_kernel,
        out_shape=jax.ShapeDtypeStruct((bp, OUT_W), jnp.float32),
        grid_spec=grid_spec,
        compiler_params=pltpu.CompilerParams(
            dimension_semantics=("parallel",)),                          # megacore / v7x TCs
    )(img_flat, tok, w_img, w_txt_eff, cats_T)


def clip_filter_forward(images, tokens, params):
    b = images.shape[0]
    # Batch tiling: BT=128 tiles for real batches (fills the MXU M dimension,
    # amortizes per-step pipeline overhead, grid >= 2 on v7x once b > 128).
    # Tiny batches (like the B=2 demo) use one 8-row-aligned tile instead of a
    # 64x zero-padded 128-row tile -- launch/DMA latency dominates there.
    bt = min(BT_MAX, _round_up(b, 8))
    bp = _round_up(b, bt)

    img_flat = images.reshape(b, -1).astype(jnp.bfloat16)                # [b, F]
    img_flat = jnp.pad(img_flat, ((0, bp - b), (0, 0)))
    tok = jnp.pad(tokens.astype(jnp.int32), ((0, bp - b), (0, 0)))       # [bp, L]

    args = (img_flat, tok, params['w_img'], params['w_txt_eff'], params['cats_T'])
    try:
        out = jax.block_until_ready(_forward_call(*args, bt=bt, single_buffer=True))
    except Exception:
        # pl.Buffered(1) (single-buffered resident weights) not supported by
        # this jax version -> fall back to default double buffering (~0.3 MiB
        # extra VMEM; functionally identical).
        out = jax.block_until_ready(_forward_call(*args, bt=bt, single_buffer=False))

    similarities = out[:b, 0]                                            # [b]
    # TODO(synk): torch would return int64 top-2 indices mixed with float
    # zeros(3,2); here the output dtype is unified to float32 (gated indices),
    # not softmax probability values.
    probs = out[:b, 1:1 + 2 * NGROUPS].reshape(b, NGROUPS, 2)            # [b, 3, 2]
    return similarities, probs


if __name__ == "__main__":
    key = jax.random.PRNGKey(0)
    kp, ki, kt = jax.random.split(key, 3)
    params = make_params(kp)

    images = jax.random.normal(ki, (B, C, H, W), jnp.float32)            # NCHW like PyTorch
    tokens = jax.random.randint(kt, (B, L), 0, V, jnp.int32)

    similarities, probs = clip_filter_forward(images, tokens, params)
    jax.block_until_ready((similarities, probs))

    assert similarities.shape == (B,)
    assert probs.shape == (B, NGROUPS, 2)
    print("KERNEL_OK")
</pallas_src>

<mosaic_0001>
module attributes {stable_mosaic.version = 11 : i64} {
  func.func @clip_filter_kernel(%arg0: i32, %arg1: memref<8x1024xbf16, #tpu.memory_space<vmem>>, %arg2: memref<8x8xi32, #tpu.memory_space<vmem>>, %arg3: memref<1024x128xbf16, #tpu.memory_space<vmem>>, %arg4: memref<64x128xbf16, #tpu.memory_space<vmem>>, %arg5: memref<128x256xbf16, #tpu.memory_space<vmem>>, %arg6: memref<8x128xf32, #tpu.memory_space<vmem>>) attributes {dimension_semantics = [#tpu.dimension_semantics<parallel>], iteration_bounds = array<i64: 1>, scalar_prefetch = 0 : i64, scratch_operands = 0 : i64, tpu.core_type = #tpu.core_type<tc>, window_params = [{transform_indices = @transform_0, window_bounds = array<i64: 8, 1024>}, {transform_indices = @transform_1, window_bounds = array<i64: 8, 8>}, {pipeline_mode = #tpu.pipeline_mode<synchronous>, transform_indices = @transform_2, window_bounds = array<i64: 1024, 128>}, {pipeline_mode = #tpu.pipeline_mode<synchronous>, transform_indices = @transform_3, window_bounds = array<i64: 64, 128>}, {pipeline_mode = #tpu.pipeline_mode<synchronous>, transform_indices = @transform_4, window_bounds = array<i64: 128, 256>}, {transform_indices = @transform_5, window_bounds = array<i64: 8, 128>}]} {
    %c0 = arith.constant 0 : index
    %c0_0 = arith.constant 0 : index
    %0 = vector.load %arg1[%c0, %c0_0] : memref<8x1024xbf16, #tpu.memory_space<vmem>>, vector<8x1024xbf16>
    %c0_1 = arith.constant 0 : index
    %c0_2 = arith.constant 0 : index
    %1 = vector.load %arg3[%c0_1, %c0_2] : memref<1024x128xbf16, #tpu.memory_space<vmem>>, vector<1024x128xbf16>
    %cst = arith.constant dense<0.000000e+00> : vector<8x128xf32>
    %2 = tpu.matmul %0, %1, %cst {dimension_numbers = #tpu.dot_dimension_numbers<[1], [0], [0], [1], [0, 0, 1, 1], [], []>} : vector<8x1024xbf16>, vector<1024x128xbf16>, vector<8x128xf32> -> vector<8x128xf32>
    %c0_3 = arith.constant 0 : index
    %c0_4 = arith.constant 0 : index
    %3 = vector.load %arg2[%c0_3, %c0_4] : memref<8x8xi32, #tpu.memory_space<vmem>>, vector<8x8xi32>
    %4 = tpu.iota {dimensions = array<i32: 1>} : vector<8x64xi32>
    %cst_5 = arith.constant 0.000000e+00 : bf16
    %5 = vector.broadcast %cst_5 : bf16 to vector<8x64xbf16>
    %6 = vector.extract_strided_slice %3 {offsets = [0, 0], sizes = [8, 1], strides = [1, 1]} : vector<8x8xi32> to vector<8x1xi32>
    %7 = vector.broadcast %6 : vector<8x1xi32> to vector<8x64xi32>
    %8 = arith.cmpi eq, %4, %7 : vector<8x64xi32>
    %9 = arith.extui %8 : vector<8x64xi1> to vector<8x64xi32>
    %10 = arith.sitofp %9 : vector<8x64xi32> to vector<8x64xf32>
    %11 = arith.truncf %10 : vector<8x64xf32> to vector<8x64xbf16>
    %12 = arith.addf %5, %11 : vector<8x64xbf16>
    %13 = vector.extract_strided_slice %3 {offsets = [0, 1], sizes = [8, 1], strides = [1, 1]} : vector<8x8xi32> to vector<8x1xi32>
    %14 = vector.broadcast %13 : vector<8x1xi32> to vector<8x64xi32>
    %15 = arith.cmpi eq, %4, %14 : vector<8x64xi32>
    %16 = arith.extui %15 : vector<8x64xi1> to vector<8x64xi32>
    %17 = arith.sitofp %16 : vector<8x64xi32> to vector<8x64xf32>
    %18 = arith.truncf %17 : vector<8x64xf32> to vector<8x64xbf16>
    %19 = arith.addf %12, %18 : vector<8x64xbf16>
    %20 = vector.extract_strided_slice %3 {offsets = [0, 2], sizes = [8, 1], strides = [1, 1]} : vector<8x8xi32> to vector<8x1xi32>
    %21 = vector.broadcast %20 : vector<8x1xi32> to vector<8x64xi32>
    %22 = arith.cmpi eq, %4, %21 : vector<8x64xi32>
    %23 = arith.extui %22 : vector<8x64xi1> to vector<8x64xi32>
    %24 = arith.sitofp %23 : vector<8x64xi32> to vector<8x64xf32>
    %25 = arith.truncf %24 : vector<8x64xf32> to vector<8x64xbf16>
    %26 = arith.addf %19, %25 : vector<8x64xbf16>
    %27 = vector.extract_strided_slice %3 {offsets = [0, 3], sizes = [8, 1], strides = [1, 1]} : vector<8x8xi32> to vector<8x1xi32>
    %28 = vector.broadcast %27 : vector<8x1xi32> to vector<8x64xi32>
    %29 = arith.cmpi eq, %4, %28 : vector<8x64xi32>
    %30 = arith.extui %29 : vector<8x64xi1> to vector<8x64xi32>
    %31 = arith.sitofp %30 : vector<8x64xi32> to vector<8x64xf32>
    %32 = arith.truncf %31 : vector<8x64xf32> to vector<8x64xbf16>
    %33 = arith.addf %26, %32 : vector<8x64xbf16>
    %34 = vector.extract_strided_slice %3 {offsets = [0, 4], sizes = [8, 1], strides = [1, 1]} : vector<8x8xi32> to vector<8x1xi32>
    %35 = vector.broadcast %34 : vector<8x1xi32> to vector<8x64xi32>
    %36 = arith.cmpi eq, %4, %35 : vector<8x64xi32>
    %37 = arith.extui %36 : vector<8x64xi1> to vector<8x64xi32>
    %38 = arith.sitofp %37 : vector<8x64xi32> to vector<8x64xf32>
    %39 = arith.truncf %38 : vector<8x64xf32> to vector<8x64xbf16>
    %40 = arith.addf %33, %39 : vector<8x64xbf16>
    %41 = vector.extract_strided_slice %3 {offsets = [0, 5], sizes = [8, 1], strides = [1, 1]} : vector<8x8xi32> to vector<8x1xi32>
    %42 = vector.broadcast %41 : vector<8x1xi32> to vector<8x64xi32>
    %43 = arith.cmpi eq, %4, %42 : vector<8x64xi32>
    %44 = arith.extui %43 : vector<8x64xi1> to vector<8x64xi32>
    %45 = arith.sitofp %44 : vector<8x64xi32> to vector<8x64xf32>
    %46 = arith.truncf %45 : vector<8x64xf32> to vector<8x64xbf16>
    %47 = arith.addf %40, %46 : vector<8x64xbf16>
    %48 = vector.extract_strided_slice %3 {offsets = [0, 6], sizes = [8, 1], strides = [1, 1]} : vector<8x8xi32> to vector<8x1xi32>
    %49 = vector.broadcast %48 : vector<8x1xi32> to vector<8x64xi32>
    %50 = arith.cmpi eq, %4, %49 : vector<8x64xi32>
    %51 = arith.extui %50 : vector<8x64xi1> to vector<8x64xi32>
    %52 = arith.sitofp %51 : vector<8x64xi32> to vector<8x64xf32>
    %53 = arith.truncf %52 : vector<8x64xf32> to vector<8x64xbf16>
    %54 = arith.addf %47, %53 : vector<8x64xbf16>
    %55 = vector.extract_strided_slice %3 {offsets = [0, 7], sizes = [8, 1], strides = [1, 1]} : vector<8x8xi32> to vector<8x1xi32>
    %56 = vector.broadcast %55 : vector<8x1xi32> to vector<8x64xi32>
    %57 = arith.cmpi eq, %4, %56 : vector<8x64xi32>
    %58 = arith.extui %57 : vector<8x64xi1> to vector<8x64xi32>
    %59 = arith.sitofp %58 : vector<8x64xi32> to vector<8x64xf32>
    %60 = arith.truncf %59 : vector<8x64xf32> to vector<8x64xbf16>
    %61 = arith.addf %54, %60 : vector<8x64xbf16>
    %c0_6 = arith.constant 0 : index
    %c0_7 = arith.constant 0 : index
    %62 = vector.load %arg4[%c0_6, %c0_7] : memref<64x128xbf16, #tpu.memory_space<vmem>>, vector<64x128xbf16>
    %cst_8 = arith.constant dense<0.000000e+00> : vector<8x128xf32>
    %63 = tpu.matmul %61, %62, %cst_8 {dimension_numbers = #tpu.dot_dimension_numbers<[1], [0], [0], [1], [0, 0, 1, 1], [], []>} : vector<8x64xbf16>, vector<64x128xbf16>, vector<8x128xf32> -> vector<8x128xf32>
    %64 = arith.mulf %2, %2 : vector<8x128xf32>
    %cst_9 = arith.constant dense<0.000000e+00> : vector<8xf32>
    %65 = vector.multi_reduction <add>, %64, %cst_9 [1] : vector<8x128xf32> to vector<8xf32>
    %66 = vector.shape_cast %65 : vector<8xf32> to vector<8x1xf32>
    %67 = arith.mulf %63, %63 : vector<8x128xf32>
    %cst_10 = arith.constant dense<0.000000e+00> : vector<8xf32>
    %68 = vector.multi_reduction <add>, %67, %cst_10 [1] : vector<8x128xf32> to vector<8xf32>
    %69 = vector.shape_cast %68 : vector<8xf32> to vector<8x1xf32>
    %70 = arith.mulf %2, %63 : vector<8x128xf32>
    %cst_11 = arith.constant dense<0.000000e+00> : vector<8xf32>
    %71 = vector.multi_reduction <add>, %70, %cst_11 [1] : vector<8x128xf32> to vector<8xf32>
    %72 = vector.shape_cast %71 : vector<8xf32> to vector<8x1xf32>
    %cst_12 = arith.constant 9.99999996E-13 : f32
    %73 = vector.broadcast %cst_12 : f32 to vector<8x1xf32>
    %74 = arith.maximumf %66, %73 : vector<8x1xf32>
    %75 = math.rsqrt %74 : vector<8x1xf32>
    %cst_13 = arith.constant 9.99999996E-13 : f32
    %76 = vector.broadcast %cst_13 : f32 to vector<8x1xf32>
    %77 = arith.maximumf %69, %76 : vector<8x1xf32>
    %78 = math.rsqrt %77 : vector<8x1xf32>
    %79 = arith.mulf %72, %75 : vector<8x1xf32>
    %80 = arith.mulf %79, %78 : vector<8x1xf32>
    %81 = vector.broadcast %75 : vector<8x1xf32> to vector<8x128xf32>
    %82 = arith.mulf %2, %81 : vector<8x128xf32>
    %83 = arith.truncf %82 : vector<8x128xf32> to vector<8x128xbf16>
    %c0_14 = arith.constant 0 : index
    %c0_15 = arith.constant 0 : index
    %84 = vector.load %arg5[%c0_14, %c0_15] : memref<128x256xbf16, #tpu.memory_space<vmem>>, vector<128x256xbf16>
    %cst_16 = arith.constant dense<0.000000e+00> : vector<8x256xf32>
    %85 = tpu.matmul %83, %84, %cst_16 {dimension_numbers = #tpu.dot_dimension_numbers<[1], [0], [0], [1], [0, 0, 1, 1], [], []>} : vector<8x128xbf16>, vector<128x256xbf16>, vector<8x256xf32> -> vector<8x256xf32>
    %86 = tpu.iota {dimensions = array<i32: 1>} : vector<8x256xi32>
    %cst_17 = arith.constant 3.000000e-01 : f32
    %87 = vector.broadcast %cst_17 : f32 to vector<8x1xf32>
    %88 = arith.cmpf olt, %80, %87 : vector<8x1xf32>
    %89 = arith.extui %88 : vector<8x1xi1> to vector<8x1xi32>
    %90 = arith.sitofp %89 : vector<8x1xi32> to vector<8x1xf32>
    %91 = tpu.iota {dimensions = array<i32: 1>} : vector<8x128xi32>
    %c0_i32 = arith.constant 0 : i32
    %92 = vector.broadcast %c0_i32 : i32 to vector<8x128xi32>
    %93 = arith.cmpi eq, %91, %92 : vector<8x128xi32>
    %cst_18 = arith.constant 0.000000e+00 : f32
    %94 = vector.broadcast %cst_18 : f32 to vector<8x128xf32>
    %95 = vector.shape_cast %80 : vector<8x1xf32> to vector<8x1xf32>
    %96 = vector.broadcast %95 : vector<8x1xf32> to vector<8x128xf32>
    %97 = arith.select %93, %96, %94 : vector<8x128xi1>, vector<8x128xf32>
    %c0_i32_19 = arith.constant 0 : i32
    %98 = vector.broadcast %c0_i32_19 : i32 to vector<8x256xi32>
    %99 = arith.cmpi sge, %86, %98 : vector<8x256xi32>
    %c35_i32 = arith.constant 35 : i32
    %100 = vector.broadcast %c35_i32 : i32 to vector<8x256xi32>
    %101 = arith.cmpi slt, %86, %100 : vector<8x256xi32>
    %102 = arith.andi %99, %101 : vector<8x256xi1>
    %cst_20 = arith.constant 0xFF800000 : f32
    %103 = vector.broadcast %cst_20 : f32 to vector<8x256xf32>
    %104 = arith.select %102, %85, %103 : vector<8x256xi1>, vector<8x256xf32>
    %cst_21 = arith.constant dense<0xFF800000> : vector<8xf32>
    %105 = vector.multi_reduction <maximumf>, %104, %cst_21 [1] : vector<8x256xf32> to vector<8xf32>
    %106 = vector.shape_cast %105 : vector<8xf32> to vector<8x1xf32>
    %107 = vector.broadcast %106 : vector<8x1xf32> to vector<8x256xf32>
    %108 = arith.cmpf oeq, %104, %107 : vector<8x256xf32>
    %c1000000000_i32 = arith.constant 1000000000 : i32
    %109 = vector.broadcast %c1000000000_i32 : i32 to vector<8x256xi32>
    %110 = arith.select %108, %86, %109 : vector<8x256xi1>, vector<8x256xi32>
    %cst_22 = arith.constant dense<2147483647> : vector<8xi32>
    %111 = vector.multi_reduction <minsi>, %110, %cst_22 [1] : vector<8x256xi32> to vector<8xi32>
    %112 = vector.shape_cast %111 : vector<8xi32> to vector<8x1xi32>
    %113 = vector.broadcast %112 : vector<8x1xi32> to vector<8x256xi32>
    %114 = arith.cmpi eq, %86, %113 : vector<8x256xi32>
    %cst_23 = arith.constant 0xFF800000 : f32
    %115 = vector.broadcast %cst_23 : f32 to vector<8x256xf32>
    %116 = arith.select %114, %115, %104 : vector<8x256xi1>, vector<8x256xf32>
    %cst_24 = arith.constant dense<0xFF800000> : vector<8xf32>
    %117 = vector.multi_reduction <maximumf>, %116, %cst_24 [1] : vector<8x256xf32> to vector<8xf32>
    %118 = vector.shape_cast %117 : vector<8xf32> to vector<8x1xf32>
    %119 = vector.broadcast %118 : vector<8x1xf32> to vector<8x256xf32>
    %120 = arith.cmpf oeq, %116, %119 : vector<8x256xf32>
    %c1000000000_i32_25 = arith.constant 1000000000 : i32
    %121 = vector.broadcast %c1000000000_i32_25 : i32 to vector<8x256xi32>
    %122 = arith.select %120, %86, %121 : vector<8x256xi1>, vector<8x256xi32>
    %cst_26 = arith.constant dense<2147483647> : vector<8xi32>
    %123 = vector.multi_reduction <minsi>, %122, %cst_26 [1] : vector<8x256xi32> to vector<8xi32>
    %124 = vector.shape_cast %123 : vector<8xi32> to vector<8x1xi32>
    %c0_i32_27 = arith.constant 0 : i32
    %125 = vector.broadcast %c0_i32_27 : i32 to vector<8x1xi32>
    %126 = arith.subi %112, %125 : vector<8x1xi32>
    %127 = arith.sitofp %126 : vector<8x1xi32> to vector<8x1xf32>
    %128 = arith.mulf %127, %90 : vector<8x1xf32>
    %c0_i32_28 = arith.constant 0 : i32
    %129 = vector.broadcast %c0_i32_28 : i32 to vector<8x1xi32>
    %130 = arith.subi %124, %129 : vector<8x1xi32>
    %131 = arith.sitofp %130 : vector<8x1xi32> to vector<8x1xf32>
    %132 = arith.mulf %131, %90 : vector<8x1xf32>
    %c1_i32 = arith.constant 1 : i32
    %133 = vector.broadcast %c1_i32 : i32 to vector<8x128xi32>
    %134 = arith.cmpi eq, %91, %133 : vector<8x128xi32>
    %135 = vector.shape_cast %128 : vector<8x1xf32> to vector<8x1xf32>
    %136 = vector.broadcast %135 : vector<8x1xf32> to vector<8x128xf32>
    %137 = arith.select %134, %136, %97 : vector<8x128xi1>, vector<8x128xf32>
    %c2_i32 = arith.constant 2 : i32
    %138 = vector.broadcast %c2_i32 : i32 to vector<8x128xi32>
    %139 = arith.cmpi eq, %91, %138 : vector<8x128xi32>
    %140 = vector.shape_cast %132 : vector<8x1xf32> to vector<8x1xf32>
    %141 = vector.broadcast %140 : vector<8x1xf32> to vector<8x128xf32>
    %142 = arith.select %139, %141, %137 : vector<8x128xi1>, vector<8x128xf32>
    %c64_i32 = arith.constant 64 : i32
    %143 = vector.broadcast %c64_i32 : i32 to vector<8x256xi32>
    %144 = arith.cmpi sge, %86, %143 : vector<8x256xi32>
    %c72_i32 = arith.constant 72 : i32
    %145 = vector.broadcast %c72_i32 : i32 to vector<8x256xi32>
    %146 = arith.cmpi slt, %86, %145 : vector<8x256xi32>
    %147 = arith.andi %144, %146 : vector<8x256xi1>
    %cst_29 = arith.constant 0xFF800000 : f32
    %148 = vector.broadcast %cst_29 : f32 to vector<8x256xf32>
    %149 = arith.select %147, %85, %148 : vector<8x256xi1>, vector<8x256xf32>
    %cst_30 = arith.constant dense<0xFF800000> : vector<8xf32>
    %150 = vector.multi_reduction <maximumf>, %149, %cst_30 [1] : vector<8x256xf32> to vector<8xf32>
    %151 = vector.shape_cast %150 : vector<8xf32> to vector<8x1xf32>
    %152 = vector.broadcast %151 : vector<8x1xf32> to vector<8x256xf32>
    %153 = arith.cmpf oeq, %149, %152 : vector<8x256xf32>
    %c1000000000_i32_31 = arith.constant 1000000000 : i32
    %154 = vector.broadcast %c1000000000_i32_31 : i32 to vector<8x256xi32>
    %155 = arith.select %153, %86, %154 : vector<8x256xi1>, vector<8x256xi32>
    %cst_32 = arith.constant dense<2147483647> : vector<8xi32>
    %156 = vector.multi_reduction <minsi>, %155, %cst_32 [1] : vector<8x256xi32> to vector<8xi32>
    %157 = vector.shape_cast %156 : vector<8xi32> to vector<8x1xi32>
    %158 = vector.broadcast %157 : vector<8x1xi32> to vector<8x256xi32>
    %159 = arith.cmpi eq, %86, %158 : vector<8x256xi32>
    %cst_33 = arith.constant 0xFF800000 : f32
    %160 = vector.broadcast %cst_33 : f32 to vector<8x256xf32>
    %161 = arith.select %159, %160, %149 : vector<8x256xi1>, vector<8x256xf32>
    %cst_34 = arith.constant dense<0xFF800000> : vector<8xf32>
    %162 = vector.multi_reduction <maximumf>, %161, %cst_34 [1] : vector<8x256xf32> to vector<8xf32>
    %163 = vector.shape_cast %162 : vector<8xf32> to vector<8x1xf32>
    %164 = vector.broadcast %163 : vector<8x1xf32> to vector<8x256xf32>
    %165 = arith.cmpf oeq, %161, %164 : vector<8x256xf32>
    %c1000000000_i32_35 = arith.constant 1000000000 : i32
    %166 = vector.broadcast %c1000000000_i32_35 : i32 to vector<8x256xi32>
    %167 = arith.select %165, %86, %166 : vector<8x256xi1>, vector<8x256xi32>
    %cst_36 = arith.constant dense<2147483647> : vector<8xi32>
    %168 = vector.multi_reduction <minsi>, %167, %cst_36 [1] : vector<8x256xi32> to vector<8xi32>
    %169 = vector.shape_cast %168 : vector<8xi32> to vector<8x1xi32>
    %c64_i32_37 = arith.constant 64 : i32
    %170 = vector.broadcast %c64_i32_37 : i32 to vector<8x1xi32>
    %171 = arith.subi %157, %170 : vector<8x1xi32>
    %172 = arith.sitofp %171 : vector<8x1xi32> to vector<8x1xf32>
    %173 = arith.mulf %172, %90 : vector<8x1xf32>
    %c64_i32_38 = arith.constant 64 : i32
    %174 = vector.broadcast %c64_i32_38 : i32 to vector<8x1xi32>
    %175 = arith.subi %169, %174 : vector<8x1xi32>
    %176 = arith.sitofp %175 : vector<8x1xi32> to vector<8x1xf32>
    %177 = arith.mulf %176, %90 : vector<8x1xf32>
    %c3_i32 = arith.constant 3 : i32
    %178 = vector.broadcast %c3_i32 : i32 to vector<8x128xi32>
    %179 = arith.cmpi eq, %91, %178 : vector<8x128xi32>
    %180 = vector.shape_cast %173 : vector<8x1xf32> to vector<8x1xf32>
    %181 = vector.broadcast %180 : vector<8x1xf32> to vector<8x128xf32>
    %182 = arith.select %179, %181, %142 : vector<8x128xi1>, vector<8x128xf32>
    %c4_i32 = arith.constant 4 : i32
    %183 = vector.broadcast %c4_i32 : i32 to vector<8x128xi32>
    %184 = arith.cmpi eq, %91, %183 : vector<8x128xi32>
    %185 = vector.shape_cast %177 : vector<8x1xf32> to vector<8x1xf32>
    %186 = vector.broadcast %185 : vector<8x1xf32> to vector<8x128xf32>
    %187 = arith.select %184, %186, %182 : vector<8x128xi1>, vector<8x128xf32>
    %c128_i32 = arith.constant 128 : i32
    %188 = vector.broadcast %c128_i32 : i32 to vector<8x256xi32>
    %189 = arith.cmpi sge, %86, %188 : vector<8x256xi32>
    %c161_i32 = arith.constant 161 : i32
    %190 = vector.broadcast %c161_i32 : i32 to vector<8x256xi32>
    %191 = arith.cmpi slt, %86, %190 : vector<8x256xi32>
    %192 = arith.andi %189, %191 : vector<8x256xi1>
    %cst_39 = arith.constant 0xFF800000 : f32
    %193 = vector.broadcast %cst_39 : f32 to vector<8x256xf32>
    %194 = arith.select %192, %85, %193 : vector<8x256xi1>, vector<8x256xf32>
    %cst_40 = arith.constant dense<0xFF800000> : vector<8xf32>
    %195 = vector.multi_reduction <maximumf>, %194, %cst_40 [1] : vector<8x256xf32> to vector<8xf32>
    %196 = vector.shape_cast %195 : vector<8xf32> to vector<8x1xf32>
    %197 = vector.broadcast %196 : vector<8x1xf32> to vector<8x256xf32>
    %198 = arith.cmpf oeq, %194, %197 : vector<8x256xf32>
    %c1000000000_i32_41 = arith.constant 1000000000 : i32
    %199 = vector.broadcast %c1000000000_i32_41 : i32 to vector<8x256xi32>
    %200 = arith.select %198, %86, %199 : vector<8x256xi1>, vector<8x256xi32>
    %cst_42 = arith.constant dense<2147483647> : vector<8xi32>
    %201 = vector.multi_reduction <minsi>, %200, %cst_42 [1] : vector<8x256xi32> to vector<8xi32>
    %202 = vector.shape_cast %201 : vector<8xi32> to vector<8x1xi32>
    %203 = vector.broadcast %202 : vector<8x1xi32> to vector<8x256xi32>
    %204 = arith.cmpi eq, %86, %203 : vector<8x256xi32>
    %cst_43 = arith.constant 0xFF800000 : f32
    %205 = vector.broadcast %cst_43 : f32 to vector<8x256xf32>
    %206 = arith.select %204, %205, %194 : vector<8x256xi1>, vector<8x256xf32>
    %cst_44 = arith.constant dense<0xFF800000> : vector<8xf32>
    %207 = vector.multi_reduction <maximumf>, %206, %cst_44 [1] : vector<8x256xf32> to vector<8xf32>
    %208 = vector.shape_cast %207 : vector<8xf32> to vector<8x1xf32>
    %209 = vector.broadcast %208 : vector<8x1xf32> to vector<8x256xf32>
    %210 = arith.cmpf oeq, %206, %209 : vector<8x256xf32>
    %c1000000000_i32_45 = arith.constant 1000000000 : i32
    %211 = vector.broadcast %c1000000000_i32_45 : i32 to vector<8x256xi32>
    %212 = arith.select %210, %86, %211 : vector<8x256xi1>, vector<8x256xi32>
    %cst_46 = arith.constant dense<2147483647> : vector<8xi32>
    %213 = vector.multi_reduction <minsi>, %212, %cst_46 [1] : vector<8x256xi32> to vector<8xi32>
    %214 = vector.shape_cast %213 : vector<8xi32> to vector<8x1xi32>
    %c128_i32_47 = arith.constant 128 : i32
    %215 = vector.broadcast %c128_i32_47 : i32 to vector<8x1xi32>
    %216 = arith.subi %202, %215 : vector<8x1xi32>
    %217 = arith.sitofp %216 : vector<8x1xi32> to vector<8x1xf32>
    %218 = arith.mulf %217, %90 : vector<8x1xf32>
    %c128_i32_48 = arith.constant 128 : i32
    %219 = vector.broadcast %c128_i32_48 : i32 to vector<8x1xi32>
    %220 = arith.subi %214, %219 : vector<8x1xi32>
    %221 = arith.sitofp %220 : vector<8x1xi32> to vector<8x1xf32>
    %222 = arith.mulf %221, %90 : vector<8x1xf32>
    %c5_i32 = arith.constant 5 : i32
    %223 = vector.broadcast %c5_i32 : i32 to vector<8x128xi32>
    %224 = arith.cmpi eq, %91, %223 : vector<8x128xi32>
    %225 = vector.shape_cast %218 : vector<8x1xf32> to vector<8x1xf32>
    %226 = vector.broadcast %225 : vector<8x1xf32> to vector<8x128xf32>
    %227 = arith.select %224, %226, %187 : vector<8x128xi1>, vector<8x128xf32>
    %c6_i32 = arith.constant 6 : i32
    %228 = vector.broadcast %c6_i32 : i32 to vector<8x128xi32>
    %229 = arith.cmpi eq, %91, %228 : vector<8x128xi32>
    %230 = vector.shape_cast %222 : vector<8x1xf32> to vector<8x1xf32>
    %231 = vector.broadcast %230 : vector<8x1xf32> to vector<8x128xf32>
    %232 = arith.select %229, %231, %227 : vector<8x128xi1>, vector<8x128xf32>
    %c0_49 = arith.constant 0 : index
    %c0_50 = arith.constant 0 : index
    %233 = vector.load %arg6[%c0_49, %c0_50] : memref<8x128xf32, #tpu.memory_space<vmem>>, vector<8x128xf32>
    tpu.vector_store %arg6[%c0_49, %c0_50], %232 {strides = array<i32>} : memref<8x128xf32, #tpu.memory_space<vmem>>, vector<8x128xf32>,
    return
  }
  func.func @transform_0(%arg0: i32) -> (i32, i32) {
    %c0_i32 = arith.constant 0 : i32
    %c0_i32_0 = arith.constant 0 : i32
    return %arg0, %c0_i32 : i32, i32
  }
  func.func @transform_1(%arg0: i32) -> (i32, i32) {
    %c0_i32 = arith.constant 0 : i32
    %c0_i32_0 = arith.constant 0 : i32
    return %arg0, %c0_i32 : i32, i32
  }
  func.func @transform_2(%arg0: i32) -> (i32, i32) {
    %c0_i32 = arith.constant 0 : i32
    %c0_i32_0 = arith.constant 0 : i32
    %c0_i32_1 = arith.constant 0 : i32
    return %c0_i32, %c0_i32_0 : i32, i32
  }
  func.func @transform_3(%arg0: i32) -> (i32, i32) {
    %c0_i32 = arith.constant 0 : i32
    %c0_i32_0 = arith.constant 0 : i32
    %c0_i32_1 = arith.constant 0 : i32
    return %c0_i32, %c0_i32_0 : i32, i32
  }
  func.func @transform_4(%arg0: i32) -> (i32, i32) {
    %c0_i32 = arith.constant 0 : i32
    %c0_i32_0 = arith.constant 0 : i32
    %c0_i32_1 = arith.constant 0 : i32
    return %c0_i32, %c0_i32_0 : i32, i32
  }
  func.func @transform_5(%arg0: i32) -> (i32, i32) {
    %c0_i32 = arith.constant 0 : i32
    %c0_i32_0 = arith.constant 0 : i32
    return %arg0, %c0_i32 : i32, i32
  }
}

module attributes {stable_mosaic.version = 11 : i64} {
  func.func @clip_filter_kernel(%arg0: i32, %arg1: memref<8x1024xbf16, #tpu.memory_space<vmem>>, %arg2: memref<8x8xi32, #tpu.memory_space<vmem>>, %arg3: memref<1024x128xbf16, #tpu.memory_space<vmem>>, %arg4: memref<64x128xbf16, #tpu.memory_space<vmem>>, %arg5: memref<128x256xbf16, #tpu.memory_space<vmem>>, %arg6: memref<8x128xf32, #tpu.memory_space<vmem>>) attributes {dimension_semantics = [#tpu.dimension_semantics<parallel>], iteration_bounds = array<i64: 1>, scalar_prefetch = 0 : i64, scratch_operands = 0 : i64, tpu.core_type = #tpu.core_type<tc>, window_params = [{transform_indices = @transform_0, window_bounds = array<i64: 8, 1024>}, {transform_indices = @transform_1, window_bounds = array<i64: 8, 8>}, {pipeline_mode = #tpu.pipeline_mode<synchronous>, transform_indices = @transform_2, window_bounds = array<i64: 1024, 128>}, {pipeline_mode = #tpu.pipeline_mode<synchronous>, transform_indices = @transform_3, window_bounds = array<i64: 64, 128>}, {pipeline_mode = #tpu.pipeline_mode<synchronous>, transform_indices = @transform_4, window_bounds = array<i64: 128, 256>}, {transform_indices = @transform_5, window_bounds = array<i64: 8, 128>}]} {
    %c0 = arith.constant 0 : index
    %c0_0 = arith.constant 0 : index
    %0 = vector.load %arg1[%c0, %c0_0] : memref<8x1024xbf16, #tpu.memory_space<vmem>>, vector<8x1024xbf16>
    %c0_1 = arith.constant 0 : index
    %c0_2 = arith.constant 0 : index
    %1 = vector.load %arg3[%c0_1, %c0_2] : memref<1024x128xbf16, #tpu.memory_space<vmem>>, vector<1024x128xbf16>
    %cst = arith.constant dense<0.000000e+00> : vector<8x128xf32>
    %2 = tpu.matmul %0, %1, %cst {dimension_numbers = #tpu.dot_dimension_numbers<[1], [0], [0], [1], [0, 0, 1, 1], [], []>} : vector<8x1024xbf16>, vector<1024x128xbf16>, vector<8x128xf32> -> vector<8x128xf32>
    %c0_3 = arith.constant 0 : index
    %c0_4 = arith.constant 0 : index
    %3 = vector.load %arg2[%c0_3, %c0_4] : memref<8x8xi32, #tpu.memory_space<vmem>>, vector<8x8xi32>
    %4 = tpu.iota {dimensions = array<i32: 1>} : vector<8x64xi32>
    %cst_5 = arith.constant 0.000000e+00 : bf16
    %5 = vector.broadcast %cst_5 : bf16 to vector<8x64xbf16>
    %6 = vector.extract_strided_slice %3 {offsets = [0, 0], sizes = [8, 1], strides = [1, 1]} : vector<8x8xi32> to vector<8x1xi32>
    %7 = vector.broadcast %6 : vector<8x1xi32> to vector<8x64xi32>
    %8 = arith.cmpi eq, %4, %7 : vector<8x64xi32>
    %9 = arith.extui %8 : vector<8x64xi1> to vector<8x64xi32>
    %10 = arith.sitofp %9 : vector<8x64xi32> to vector<8x64xf32>
    %11 = arith.truncf %10 : vector<8x64xf32> to vector<8x64xbf16>
    %12 = arith.addf %5, %11 : vector<8x64xbf16>
    %13 = vector.extract_strided_slice %3 {offsets = [0, 1], sizes = [8, 1], strides = [1, 1]} : vector<8x8xi32> to vector<8x1xi32>
    %14 = vector.broadcast %13 : vector<8x1xi32> to vector<8x64xi32>
    %15 = arith.cmpi eq, %4, %14 : vector<8x64xi32>
    %16 = arith.extui %15 : vector<8x64xi1> to vector<8x64xi32>
    %17 = arith.sitofp %16 : vector<8x64xi32> to vector<8x64xf32>
    %18 = arith.truncf %17 : vector<8x64xf32> to vector<8x64xbf16>
    %19 = arith.addf %12, %18 : vector<8x64xbf16>
    %20 = vector.extract_strided_slice %3 {offsets = [0, 2], sizes = [8, 1], strides = [1, 1]} : vector<8x8xi32> to vector<8x1xi32>
    %21 = vector.broadcast %20 : vector<8x1xi32> to vector<8x64xi32>
    %22 = arith.cmpi eq, %4, %21 : vector<8x64xi32>
    %23 = arith.extui %22 : vector<8x64xi1> to vector<8x64xi32>
    %24 = arith.sitofp %23 : vector<8x64xi32> to vector<8x64xf32>
    %25 = arith.truncf %24 : vector<8x64xf32> to vector<8x64xbf16>
    %26 = arith.addf %19, %25 : vector<8x64xbf16>
    %27 = vector.extract_strided_slice %3 {offsets = [0, 3], sizes = [8, 1], strides = [1, 1]} : vector<8x8xi32> to vector<8x1xi32>
    %28 = vector.broadcast %27 : vector<8x1xi32> to vector<8x64xi32>
    %29 = arith.cmpi eq, %4, %28 : vector<8x64xi32>
    %30 = arith.extui %29 : vector<8x64xi1> to vector<8x64xi32>
    %31 = arith.sitofp %30 : vector<8x64xi32> to vector<8x64xf32>
    %32 = arith.truncf %31 : vector<8x64xf32> to vector<8x64xbf16>
    %33 = arith.addf %26, %32 : vector<8x64xbf16>
    %34 = vector.extract_strided_slice %3 {offsets = [0, 4], sizes = [8, 1], strides = [1, 1]} : vector<8x8xi32> to vector<8x1xi32>
    %35 = vector.broadcast %34 : vector<8x1xi32> to vector<8x64xi32>
    %36 = arith.cmpi eq, %4, %35 : vector<8x64xi32>
    %37 = arith.extui %36 : vector<8x64xi1> to vector<8x64xi32>
    %38 = arith.sitofp %37 : vector<8x64xi32> to vector<8x64xf32>
    %39 = arith.truncf %38 : vector<8x64xf32> to vector<8x64xbf16>
    %40 = arith.addf %33, %39 : vector<8x64xbf16>
    %41 = vector.extract_strided_slice %3 {offsets = [0, 5], sizes = [8, 1], strides = [1, 1]} : vector<8x8xi32> to vector<8x1xi32>
    %42 = vector.broadcast %41 : vector<8x1xi32> to vector<8x64xi32>
    %43 = arith.cmpi eq, %4, %42 : vector<8x64xi32>
    %44 = arith.extui %43 : vector<8x64xi1> to vector<8x64xi32>
    %45 = arith.sitofp %44 : vector<8x64xi32> to vector<8x64xf32>
    %46 = arith.truncf %45 : vector<8x64xf32> to vector<8x64xbf16>
    %47 = arith.addf %40, %46 : vector<8x64xbf16>
    %48 = vector.extract_strided_slice %3 {offsets = [0, 6], sizes = [8, 1], strides = [1, 1]} : vector<8x8xi32> to vector<8x1xi32>
    %49 = vector.broadcast %48 : vector<8x1xi32> to vector<8x64xi32>
    %50 = arith.cmpi eq, %4, %49 : vector<8x64xi32>
    %51 = arith.extui %50 : vector<8x64xi1> to vector<8x64xi32>
    %52 = arith.sitofp %51 : vector<8x64xi32> to vector<8x64xf32>
    %53 = arith.truncf %52 : vector<8x64xf32> to vector<8x64xbf16>
    %54 = arith.addf %47, %53 : vector<8x64xbf16>
    %55 = vector.extract_strided_slice %3 {offsets = [0, 7], sizes = [8, 1], strides = [1, 1]} : vector<8x8xi32> to vector<8x1xi32>
    %56 = vector.broadcast %55 : vector<8x1xi32> to vector<8x64xi32>
    %57 = arith.cmpi eq, %4, %56 : vector<8x64xi32>
    %58 = arith.extui %57 : vector<8x64xi1> to vector<8x64xi32>
    %59 = arith.sitofp %58 : vector<8x64xi32> to vector<8x64xf32>
    %60 = arith.truncf %59 : vector<8x64xf32> to vector<8x64xbf16>
    %61 = arith.addf %54, %60 : vector<8x64xbf16>
    %c0_6 = arith.constant 0 : index
    %c0_7 = arith.constant 0 : index
    %62 = vector.load %arg4[%c0_6, %c0_7] : memref<64x128xbf16, #tpu.memory_space<vmem>>, vector<64x128xbf16>
    %cst_8 = arith.constant dense<0.000000e+00> : vector<8x128xf32>
    %63 = tpu.matmul %61, %62, %cst_8 {dimension_numbers = #tpu.dot_dimension_numbers<[1], [0], [0], [1], [0, 0, 1, 1], [], []>} : vector<8x64xbf16>, vector<64x128xbf16>, vector<8x128xf32> -> vector<8x128xf32>
    %64 = arith.mulf %2, %2 : vector<8x128xf32>
    %cst_9 = arith.constant dense<0.000000e+00> : vector<8xf32>
    %65 = vector.multi_reduction <add>, %64, %cst_9 [1] : vector<8x128xf32> to vector<8xf32>
    %66 = vector.shape_cast %65 : vector<8xf32> to vector<8x1xf32>
    %67 = arith.mulf %63, %63 : vector<8x128xf32>
    %cst_10 = arith.constant dense<0.000000e+00> : vector<8xf32>
    %68 = vector.multi_reduction <add>, %67, %cst_10 [1] : vector<8x128xf32> to vector<8xf32>
    %69 = vector.shape_cast %68 : vector<8xf32> to vector<8x1xf32>
    %70 = arith.mulf %2, %63 : vector<8x128xf32>
    %cst_11 = arith.constant dense<0.000000e+00> : vector<8xf32>
    %71 = vector.multi_reduction <add>, %70, %cst_11 [1] : vector<8x128xf32> to vector<8xf32>
    %72 = vector.shape_cast %71 : vector<8xf32> to vector<8x1xf32>
    %cst_12 = arith.constant 9.99999996E-13 : f32
    %73 = vector.broadcast %cst_12 : f32 to vector<8x1xf32>
    %74 = arith.maximumf %66, %73 : vector<8x1xf32>
    %75 = math.rsqrt %74 : vector<8x1xf32>
    %cst_13 = arith.constant 9.99999996E-13 : f32
    %76 = vector.broadcast %cst_13 : f32 to vector<8x1xf32>
    %77 = arith.maximumf %69, %76 : vector<8x1xf32>
    %78 = math.rsqrt %77 : vector<8x1xf32>
    %79 = arith.mulf %72, %75 : vector<8x1xf32>
    %80 = arith.mulf %79, %78 : vector<8x1xf32>
    %81 = vector.broadcast %75 : vector<8x1xf32> to vector<8x128xf32>
    %82 = arith.mulf %2, %81 : vector<8x128xf32>
    %83 = arith.truncf %82 : vector<8x128xf32> to vector<8x128xbf16>
    %c0_14 = arith.constant 0 : index
    %c0_15 = arith.constant 0 : index
    %84 = vector.load %arg5[%c0_14, %c0_15] : memref<128x256xbf16, #tpu.memory_space<vmem>>, vector<128x256xbf16>
    %cst_16 = arith.constant dense<0.000000e+00> : vector<8x256xf32>
    %85 = tpu.matmul %83, %84, %cst_16 {dimension_numbers = #tpu.dot_dimension_numbers<[1], [0], [0], [1], [0, 0, 1, 1], [], []>} : vector<8x128xbf16>, vector<128x256xbf16>, vector<8x256xf32> -> vector<8x256xf32>
    %86 = tpu.iota {dimensions = array<i32: 1>} : vector<8x256xi32>
    %cst_17 = arith.constant 3.000000e-01 : f32
    %87 = vector.broadcast %cst_17 : f32 to vector<8x1xf32>
    %88 = arith.cmpf olt, %80, %87 : vector<8x1xf32>
    %89 = arith.extui %88 : vector<8x1xi1> to vector<8x1xi32>
    %90 = arith.sitofp %89 : vector<8x1xi32> to vector<8x1xf32>
    %91 = tpu.iota {dimensions = array<i32: 1>} : vector<8x128xi32>
    %c0_i32 = arith.constant 0 : i32
    %92 = vector.broadcast %c0_i32 : i32 to vector<8x128xi32>
    %93 = arith.cmpi eq, %91, %92 : vector<8x128xi32>
    %cst_18 = arith.constant 0.000000e+00 : f32
    %94 = vector.broadcast %cst_18 : f32 to vector<8x128xf32>
    %95 = vector.shape_cast %80 : vector<8x1xf32> to vector<8x1xf32>
    %96 = vector.broadcast %95 : vector<8x1xf32> to vector<8x128xf32>
    %97 = arith.select %93, %96, %94 : vector<8x128xi1>, vector<8x128xf32>
    %c0_i32_19 = arith.constant 0 : i32
    %98 = vector.broadcast %c0_i32_19 : i32 to vector<8x256xi32>
    %99 = arith.cmpi sge, %86, %98 : vector<8x256xi32>
    %c35_i32 = arith.constant 35 : i32
    %100 = vector.broadcast %c35_i32 : i32 to vector<8x256xi32>
    %101 = arith.cmpi slt, %86, %100 : vector<8x256xi32>
    %102 = arith.andi %99, %101 : vector<8x256xi1>
    %cst_20 = arith.constant 0xFF800000 : f32
    %103 = vector.broadcast %cst_20 : f32 to vector<8x256xf32>
    %104 = arith.select %102, %85, %103 : vector<8x256xi1>, vector<8x256xf32>
    %cst_21 = arith.constant dense<0xFF800000> : vector<8xf32>
    %105 = vector.multi_reduction <maximumf>, %104, %cst_21 [1] : vector<8x256xf32> to vector<8xf32>
    %106 = vector.shape_cast %105 : vector<8xf32> to vector<8x1xf32>
    %107 = vector.broadcast %106 : vector<8x1xf32> to vector<8x256xf32>
    %108 = arith.cmpf oeq, %104, %107 : vector<8x256xf32>
    %c1000000000_i32 = arith.constant 1000000000 : i32
    %109 = vector.broadcast %c1000000000_i32 : i32 to vector<8x256xi32>
    %110 = arith.select %108, %86, %109 : vector<8x256xi1>, vector<8x256xi32>
    %cst_22 = arith.constant dense<2147483647> : vector<8xi32>
    %111 = vector.multi_reduction <minsi>, %110, %cst_22 [1] : vector<8x256xi32> to vector<8xi32>
    %112 = vector.shape_cast %111 : vector<8xi32> to vector<8x1xi32>
    %113 = vector.broadcast %112 : vector<8x1xi32> to vector<8x256xi32>
    %114 = arith.cmpi eq, %86, %113 : vector<8x256xi32>
    %cst_23 = arith.constant 0xFF800000 : f32
    %115 = vector.broadcast %cst_23 : f32 to vector<8x256xf32>
    %116 = arith.select %114, %115, %104 : vector<8x256xi1>, vector<8x256xf32>
    %cst_24 = arith.constant dense<0xFF800000> : vector<8xf32>
    %117 = vector.multi_reduction <maximumf>, %116, %cst_24 [1] : vector<8x256xf32> to vector<8xf32>
    %118 = vector.shape_cast %117 : vector<8xf32> to vector<8x1xf32>
    %119 = vector.broadcast %118 : vector<8x1xf32> to vector<8x256xf32>
    %120 = arith.cmpf oeq, %116, %119 : vector<8x256xf32>
    %c1000000000_i32_25 = arith.constant 1000000000 : i32
    %121 = vector.broadcast %c1000000000_i32_25 : i32 to vector<8x256xi32>
    %122 = arith.select %120, %86, %121 : vector<8x256xi1>, vector<8x256xi32>
    %cst_26 = arith.constant dense<2147483647> : vector<8xi32>
    %123 = vector.multi_reduction <minsi>, %122, %cst_26 [1] : vector<8x256xi32> to vector<8xi32>
    %124 = vector.shape_cast %123 : vector<8xi32> to vector<8x1xi32>
    %c0_i32_27 = arith.constant 0 : i32
    %125 = vector.broadcast %c0_i32_27 : i32 to vector<8x1xi32>
    %126 = arith.subi %112, %125 : vector<8x1xi32>
    %127 = arith.sitofp %126 : vector<8x1xi32> to vector<8x1xf32>
    %128 = arith.mulf %127, %90 : vector<8x1xf32>
    %c0_i32_28 = arith.constant 0 : i32
    %129 = vector.broadcast %c0_i32_28 : i32 to vector<8x1xi32>
    %130 = arith.subi %124, %129 : vector<8x1xi32>
    %131 = arith.sitofp %130 : vector<8x1xi32> to vector<8x1xf32>
    %132 = arith.mulf %131, %90 : vector<8x1xf32>
    %c1_i32 = arith.constant 1 : i32
    %133 = vector.broadcast %c1_i32 : i32 to vector<8x128xi32>
    %134 = arith.cmpi eq, %91, %133 : vector<8x128xi32>
    %135 = vector.shape_cast %128 : vector<8x1xf32> to vector<8x1xf32>
    %136 = vector.broadcast %135 : vector<8x1xf32> to vector<8x128xf32>
    %137 = arith.select %134, %136, %97 : vector<8x128xi1>, vector<8x128xf32>
    %c2_i32 = arith.constant 2 : i32
    %138 = vector.broadcast %c2_i32 : i32 to vector<8x128xi32>
    %139 = arith.cmpi eq, %91, %138 : vector<8x128xi32>
    %140 = vector.shape_cast %132 : vector<8x1xf32> to vector<8x1xf32>
    %141 = vector.broadcast %140 : vector<8x1xf32> to vector<8x128xf32>
    %142 = arith.select %139, %141, %137 : vector<8x128xi1>, vector<8x128xf32>
    %c64_i32 = arith.constant 64 : i32
    %143 = vector.broadcast %c64_i32 : i32 to vector<8x256xi32>
    %144 = arith.cmpi sge, %86, %143 : vector<8x256xi32>
    %c72_i32 = arith.constant 72 : i32
    %145 = vector.broadcast %c72_i32 : i32 to vector<8x256xi32>
    %146 = arith.cmpi slt, %86, %145 : vector<8x256xi32>
    %147 = arith.andi %144, %146 : vector<8x256xi1>
    %cst_29 = arith.constant 0xFF800000 : f32
    %148 = vector.broadcast %cst_29 : f32 to vector<8x256xf32>
    %149 = arith.select %147, %85, %148 : vector<8x256xi1>, vector<8x256xf32>
    %cst_30 = arith.constant dense<0xFF800000> : vector<8xf32>
    %150 = vector.multi_reduction <maximumf>, %149, %cst_30 [1] : vector<8x256xf32> to vector<8xf32>
    %151 = vector.shape_cast %150 : vector<8xf32> to vector<8x1xf32>
    %152 = vector.broadcast %151 : vector<8x1xf32> to vector<8x256xf32>
    %153 = arith.cmpf oeq, %149, %152 : vector<8x256xf32>
    %c1000000000_i32_31 = arith.constant 1000000000 : i32
    %154 = vector.broadcast %c1000000000_i32_31 : i32 to vector<8x256xi32>
    %155 = arith.select %153, %86, %154 : vector<8x256xi1>, vector<8x256xi32>
    %cst_32 = arith.constant dense<2147483647> : vector<8xi32>
    %156 = vector.multi_reduction <minsi>, %155, %cst_32 [1] : vector<8x256xi32> to vector<8xi32>
    %157 = vector.shape_cast %156 : vector<8xi32> to vector<8x1xi32>
    %158 = vector.broadcast %157 : vector<8x1xi32> to vector<8x256xi32>
    %159 = arith.cmpi eq, %86, %158 : vector<8x256xi32>
    %cst_33 = arith.constant 0xFF800000 : f32
    %160 = vector.broadcast %cst_33 : f32 to vector<8x256xf32>
    %161 = arith.select %159, %160, %149 : vector<8x256xi1>, vector<8x256xf32>
    %cst_34 = arith.constant dense<0xFF800000> : vector<8xf32>
    %162 = vector.multi_reduction <maximumf>, %161, %cst_34 [1] : vector<8x256xf32> to vector<8xf32>
    %163 = vector.shape_cast %162 : vector<8xf32> to vector<8x1xf32>
    %164 = vector.broadcast %163 : vector<8x1xf32> to vector<8x256xf32>
    %165 = arith.cmpf oeq, %161, %164 : vector<8x256xf32>
    %c1000000000_i32_35 = arith.constant 1000000000 : i32
    %166 = vector.broadcast %c1000000000_i32_35 : i32 to vector<8x256xi32>
    %167 = arith.select %165, %86, %166 : vector<8x256xi1>, vector<8x256xi32>
    %cst_36 = arith.constant dense<2147483647> : vector<8xi32>
    %168 = vector.multi_reduction <minsi>, %167, %cst_36 [1] : vector<8x256xi32> to vector<8xi32>
    %169 = vector.shape_cast %168 : vector<8xi32> to vector<8x1xi32>
    %c64_i32_37 = arith.constant 64 : i32
    %170 = vector.broadcast %c64_i32_37 : i32 to vector<8x1xi32>
    %171 = arith.subi %157, %170 : vector<8x1xi32>
    %172 = arith.sitofp %171 : vector<8x1xi32> to vector<8x1xf32>
    %173 = arith.mulf %172, %90 : vector<8x1xf32>
    %c64_i32_38 = arith.constant 64 : i32
    %174 = vector.broadcast %c64_i32_38 : i32 to vector<8x1xi32>
    %175 = arith.subi %169, %174 : vector<8x1xi32>
    %176 = arith.sitofp %175 : vector<8x1xi32> to vector<8x1xf32>
    %177 = arith.mulf %176, %90 : vector<8x1xf32>
    %c3_i32 = arith.constant 3 : i32
    %178 = vector.broadcast %c3_i32 : i32 to vector<8x128xi32>
    %179 = arith.cmpi eq, %91, %178 : vector<8x128xi32>
    %180 = vector.shape_cast %173 : vector<8x1xf32> to vector<8x1xf32>
    %181 = vector.broadcast %180 : vector<8x1xf32> to vector<8x128xf32>
    %182 = arith.select %179, %181, %142 : vector<8x128xi1>, vector<8x128xf32>
    %c4_i32 = arith.constant 4 : i32
    %183 = vector.broadcast %c4_i32 : i32 to vector<8x128xi32>
    %184 = arith.cmpi eq, %91, %183 : vector<8x128xi32>
    %185 = vector.shape_cast %177 : vector<8x1xf32> to vector<8x1xf32>
    %186 = vector.broadcast %185 : vector<8x1xf32> to vector<8x128xf32>
    %187 = arith.select %184, %186, %182 : vector<8x128xi1>, vector<8x128xf32>
    %c128_i32 = arith.constant 128 : i32
    %188 = vector.broadcast %c128_i32 : i32 to vector<8x256xi32>
    %189 = arith.cmpi sge, %86, %188 : vector<8x256xi32>
    %c161_i32 = arith.constant 161 : i32
    %190 = vector.broadcast %c161_i32 : i32 to vector<8x256xi32>
    %191 = arith.cmpi slt, %86, %190 : vector<8x256xi32>
    %192 = arith.andi %189, %191 : vector<8x256xi1>
    %cst_39 = arith.constant 0xFF800000 : f32
    %193 = vector.broadcast %cst_39 : f32 to vector<8x256xf32>
    %194 = arith.select %192, %85, %193 : vector<8x256xi1>, vector<8x256xf32>
    %cst_40 = arith.constant dense<0xFF800000> : vector<8xf32>
    %195 = vector.multi_reduction <maximumf>, %194, %cst_40 [1] : vector<8x256xf32> to vector<8xf32>
    %196 = vector.shape_cast %195 : vector<8xf32> to vector<8x1xf32>
    %197 = vector.broadcast %196 : vector<8x1xf32> to vector<8x256xf32>
    %198 = arith.cmpf oeq, %194, %197 : vector<8x256xf32>
    %c1000000000_i32_41 = arith.constant 1000000000 : i32
    %199 = vector.broadcast %c1000000000_i32_41 : i32 to vector<8x256xi32>
    %200 = arith.select %198, %86, %199 : vector<8x256xi1>, vector<8x256xi32>
    %cst_42 = arith.constant dense<2147483647> : vector<8xi32>
    %201 = vector.multi_reduction <minsi>, %200, %cst_42 [1] : vector<8x256xi32> to vector<8xi32>
    %202 = vector.shape_cast %201 : vector<8xi32> to vector<8x1xi32>
    %203 = vector.broadcast %202 : vector<8x1xi32> to vector<8x256xi32>
    %204 = arith.cmpi eq, %86, %203 : vector<8x256xi32>
    %cst_43 = arith.constant 0xFF800000 : f32
    %205 = vector.broadcast %cst_43 : f32 to vector<8x256xf32>
    %206 = arith.select %204, %205, %194 : vector<8x256xi1>, vector<8x256xf32>
    %cst_44 = arith.constant dense<0xFF800000> : vector<8xf32>
    %207 = vector.multi_reduction <maximumf>, %206, %cst_44 [1] : vector<8x256xf32> to vector<8xf32>
    %208 = vector.shape_cast %207 : vector<8xf32> to vector<8x1xf32>
    %209 = vector.broadcast %208 : vector<8x1xf32> to vector<8x256xf32>
    %210 = arith.cmpf oeq, %206, %209 : vector<8x256xf32>
    %c1000000000_i32_45 = arith.constant 1000000000 : i32
    %211 = vector.broadcast %c1000000000_i32_45 : i32 to vector<8x256xi32>
    %212 = arith.select %210, %86, %211 : vector<8x256xi1>, vector<8x256xi32>
    %cst_46 = arith.constant dense<2147483647> : vector<8xi32>
    %213 = vector.multi_reduction <minsi>, %212, %cst_46 [1] : vector<8x256xi32> to vector<8xi32>
    %214 = vector.shape_cast %213 : vector<8xi32> to vector<8x1xi32>
    %c128_i32_47 = arith.constant 128 : i32
    %215 = vector.broadcast %c128_i32_47 : i32 to vector<8x1xi32>
    %216 = arith.subi %202, %215 : vector<8x1xi32>
    %217 = arith.sitofp %216 : vector<8x1xi32> to vector<8x1xf32>
    %218 = arith.mulf %217, %90 : vector<8x1xf32>
    %c128_i32_48 = arith.constant 128 : i32
    %219 = vector.broadcast %c128_i32_48 : i32 to vector<8x1xi32>
    %220 = arith.subi %214, %219 : vector<8x1xi32>
    %221 = arith.sitofp %220 : vector<8x1xi32> to vector<8x1xf32>
    %222 = arith.mulf %221, %90 : vector<8x1xf32>
    %c5_i32 = arith.constant 5 : i32
    %223 = vector.broadcast %c5_i32 : i32 to vector<8x128xi32>
    %224 = arith.cmpi eq, %91, %223 : vector<8x128xi32>
    %225 = vector.shape_cast %218 : vector<8x1xf32> to vector<8x1xf32>
    %226 = vector.broadcast %225 : vector<8x1xf32> to vector<8x128xf32>
    %227 = arith.select %224, %226, %187 : vector<8x128xi1>, vector<8x128xf32>
    %c6_i32 = arith.constant 6 : i32
    %228 = vector.broadcast %c6_i32 : i32 to vector<8x128xi32>
    %229 = arith.cmpi eq, %91, %228 : vector<8x128xi32>
    %230 = vector.shape_cast %222 : vector<8x1xf32> to vector<8x1xf32>
    %231 = vector.broadcast %230 : vector<8x1xf32> to vector<8x128xf32>
    %232 = arith.select %229, %231, %227 : vector<8x128xi1>, vector<8x128xf32>
    %c0_49 = arith.constant 0 : index
    %c0_50 = arith.constant 0 : index
    %233 = vector.load %arg6[%c0_49, %c0_50] : memref<8x128xf32, #tpu.memory_space<vmem>>, vector<8x128xf32>
    tpu.vector_store %arg6[%c0_49, %c0_50], %232 {strides = array<i32>} : memref<8x128xf32, #tpu.memory_space<vmem>>, vector<8x128xf32>,
    return
  }
  func.func @transform_0(%arg0: i32) -> (i32, i32) {
    %c0_i32 = arith.constant 0 : i32
    %c0_i32_0 = arith.constant 0 : i32
    return %arg0, %c0_i32 : i32, i32
  }
  func.func @transform_1(%arg0: i32) -> (i32, i32) {
    %c0_i32 = arith.constant 0 : i32
    %c0_i32_0 = arith.constant 0 : i32
    return %arg0, %c0_i32 : i32, i32
  }
  func.func @transform_2(%arg0: i32) -> (i32, i32) {
    %c0_i32 = arith.constant 0 : i32
    %c0_i32_0 = arith.constant 0 : i32
    %c0_i32_1 = arith.constant 0 : i32
    return %c0_i32, %c0_i32_0 : i32, i32
  }
  func.func @transform_3(%arg0: i32) -> (i32, i32) {
    %c0_i32 = arith.constant 0 : i32
    %c0_i32_0 = arith.constant 0 : i32
    %c0_i32_1 = arith.constant 0 : i32
    return %c0_i32, %c0_i32_0 : i32, i32
  }
  func.func @transform_4(%arg0: i32) -> (i32, i32) {
    %c0_i32 = arith.constant 0 : i32
    %c0_i32_0 = arith.constant 0 : i32
    %c0_i32_1 = arith.constant 0 : i32
    return %c0_i32, %c0_i32_0 : i32, i32
  }
  func.func @transform_5(%arg0: i32) -> (i32, i32) {
    %c0_i32 = arith.constant 0 : i32
    %c0_i32_0 = arith.constant 0 : i32
    return %arg0, %c0_i32 : i32, i32
  }
}

</mosaic_0001>

<bundles_post_ra>
// kernel: _forward_call.1
= control target key start
LH: loop header
LB: loop body
LE: loop exit
PB: predicated region body
PF: predicated region fallthrough
CT: control target
= control target key end

     0   :  { %10 = vsyncpa [#allocation3], 0  ;;  %s2044_s0 = inlined_call_operand.hbm [shape: bf16[8,1024], index: 0, kind: input, shape index: {}]   ;;  %s2045_s1 = inlined_call_operand.hbm [shape: s32[8,8], index: 1, kind: input, shape index: {}]   ;;  %s2046_s2 = inlined_call_operand.hbm [shape: bf16[1024,128], index: 2, kind: input, shape index: {}]   ;;  %s2047_s3 = inlined_call_operand.hbm [shape: bf16[64,128], index: 3, kind: input, shape index: {}]   ;;  %s2048_s4 = inlined_call_operand.hbm [shape: bf16[128,256], index: 4, kind: input, shape index: {}]   ;;  %s2049_s5 = inlined_call_operand.hbm [shape: f32[8,128], index: 5, kind: output, shape index: {}]  }
   0x1   :  { %11 = vsyncpa [#allocation6], 0 }
   0x2   :  { %12 = vsyncpa [#allocation9], 0  ;;  %s30_s20 = sshll.u32 %s2045_s1, 4  ;;  %s31_s20 = int_to_ptr.hbm [resolvable:$true] %s30_s20 }
   0x3   :  { %13 = vsyncpa [#allocation4], 0  ;;  %s1892_s21 = smov [#allocation5]   ;;  %s53_s25 = sshll.u32 %s2047_s3, 4  ;;  %s54_s25 = int_to_ptr.hbm [resolvable:$true] %s53_s25 }
   0x4   :  { %s32_s22 = sshll.u32 %s1892_s21, 4  ;;  %s1893_s26 = smov [#allocation8]   ;;  %s33_s22 = int_to_ptr.vmem [resolvable:$true] %s32_s22 }
   0x5   :  { %35 = dma.hbm_to_vmem [thread:$0]  %s31_s20, 128, %s33_s22, [#allocation6]  }
   0x6   :  { %s55_s27 = sshll.u32 %s1893_s26, 4  ;;  %s19_s30 = sshll.u32 %s2044_s0, 4  ;;  %s56_s27 = int_to_ptr.vmem [resolvable:$true] %s55_s27  ;;  %s20_s30 = int_to_ptr.hbm [resolvable:$true] %s19_s30 }
   0x7   :  { %s1894_s1 = smov 64   ;;  %s1895_s6 = smov 4  }
   0x8   :  { %61 = dma.hbm_to_vmem [thread:$0]  %s54_s25, 512, %s56_s27, [#allocation9], %s1894_s1, %s1894_s1, %s1895_s6  }
   0x9   :  { %s40_s9 = sshll.u32 %s2046_s2, 4  ;;  %s1896_s10 = smov [#allocation2]   ;;  %s41_s9 = int_to_ptr.hbm [resolvable:$true] %s40_s9 }
   0xa   :  { %s21_s11 = sshll.u32 %s1896_s10, 4  ;;  %s1897_s3 = smov [#allocation7]   ;;  %s22_s11 = int_to_ptr.vmem [resolvable:$true] %s21_s11 }
   0xb   :  { %24 = dma.hbm_to_vmem [thread:$0]  %s20_s30, 512, %s22_s11, [#allocation3]  }
   0xc   :  { %s42_s12 = sshll.u32 %s1897_s3, 4  ;;  %s66_s0 = sshll.u32 %s2048_s4, 4  ;;  %s43_s12 = int_to_ptr.vmem [resolvable:$true] %s42_s12  ;;  %s67_s0 = int_to_ptr.hbm [resolvable:$true] %s66_s0 }
   0xd   :  { %48 = dma.hbm_to_vmem [thread:$0]  %s41_s9, 8192, %s43_s12, [#allocation6], %s1894_s1, %s1894_s1, %s1895_s6  }
   0xe   :  { %s1898_s15 = smov [#allocation10]   ;;  %s1899_s17 = smov 128  }
   0xf   :  { %s68_s16 = sshll.u32 %s1898_s15, 4  ;;  %s1900_s18 = smov 8   ;;  %s69_s16 = int_to_ptr.vmem [resolvable:$true] %s68_s16 }
  0x10   :  { %74 = dma.hbm_to_vmem [thread:$0]  %s67_s0, 2048, %s69_s16, [#allocation9], %s1899_s17, %s1899_s17, %s1900_s18  }
  0x11   :  { %1884 = dma.done.wait [#allocation3], 512  }
  0x12   :  { %1885 = vsyncadd [#allocation3], 4294966784 }
  0x13   :  { %1886 = dma.done.wait [#allocation6], 8320  }
  0x14   :  { %1887 = vsyncadd [#allocation6], 4294958976 }
  0x15   :  { %1888 = dma.done.wait [#allocation9], 2560  }
  0x16   :  { %1889 = vsyncadd [#allocation9], 4294964736  ;;  %v1631_v0 = vld [vmem:[#allocation7 + $0x38] sm:$0xff]  ;;  %v1630_v4 = vld [vmem:[#allocation7 + $0x30] sm:$0xff]  ;;  %s1910_s2 = smov [#allocation11]   ;;  %s1256_s21 = sshll.u32 %s2049_s5, 4  ;;  %s1257_s21 = int_to_ptr.hbm [resolvable:$true] %s1256_s21 }
  0x17   :  { %v1639_v1 = vld [vmem:[#allocation7 + $0x78] sm:$0xff]  ;;  %640 = vmatpush.bf16.msra.mxu0 %v1631_v0  ;;  %v1638_v5 = vld [vmem:[#allocation7 + $0x70] sm:$0xff]  ;;  %v1629_v8 = vld [vmem:[#allocation7 + $0x28] sm:$0xff]  ;;  %s1254_s4 = sshll.u32 %s1910_s2, 4  ;;  %s1255_s4 = int_to_ptr.vmem [resolvable:$true] %s1254_s4 }
  0x18   :  { %v1647_v2 = vld [vmem:[#allocation7 + $0xb8] sm:$0xff]  ;;  %653 = vmatpush.bf16.msra.mxu1 %v1639_v1  ;;  %v1646_v6 = vld [vmem:[#allocation7 + $0xb0] sm:$0xff]  ;;  %v1637_v9 = vld [vmem:[#allocation7 + $0x68] sm:$0xff] }
  0x19   :  { %v1655_v3 = vld [vmem:[#allocation7 + $0xf8] sm:$0xff]  ;;  %666 = vmatpush.bf16.msra.mxu2 %v1647_v2  ;;  %v1654_v7 = vld [vmem:[#allocation7 + $0xf0] sm:$0xff]  ;;  %v1645_v10 = vld [vmem:[#allocation7 + $0xa8] sm:$0xff] }
  0x1a   :  { %679 = vmatpush.bf16.msra.mxu3 %v1655_v3  ;;  %v1653_v11 = vld [vmem:[#allocation7 + $0xe8] sm:$0xff]  ;;  %v1628_v12 = vld [vmem:[#allocation7 + $0x20] sm:$0xff]  ;;  %v1627_v16 = vld [vmem:[#allocation7 + $0x18] sm:$0xff] }
  0x1b   :  { %641 = vmatpush.bf16.msra.mxu0 %v1630_v4  ;;  %v1636_v13 = vld [vmem:[#allocation7 + $0x60] sm:$0xff]  ;;  %v1635_v17 = vld [vmem:[#allocation7 + $0x58] sm:$0xff]  ;;  %v1626_v20 = vld [vmem:[#allocation7 + $0x10] sm:$0xff] }
  0x1c   :  { %654 = vmatpush.bf16.msra.mxu1 %v1638_v5  ;;  %v1644_v14 = vld [vmem:[#allocation7 + $0xa0] sm:$0xff]  ;;  %v1643_v18 = vld [vmem:[#allocation7 + $0x98] sm:$0xff]  ;;  %v1634_v21 = vld [vmem:[#allocation7 + $0x50] sm:$0xff] }
  0x1d   :  { %667 = vmatpush.bf16.msra.mxu2 %v1646_v6  ;;  %v1652_v15 = vld [vmem:[#allocation7 + $0xe0] sm:$0xff]  ;;  %v1651_v19 = vld [vmem:[#allocation7 + $0xd8] sm:$0xff]  ;;  %v1642_v22 = vld [vmem:[#allocation7 + $0x90] sm:$0xff] }
  0x1e   :  { %680 = vmatpush.bf16.msra.mxu3 %v1654_v7  ;;  %v1650_v23 = vld [vmem:[#allocation7 + $0xd0] sm:$0xff]  ;;  %v1625_v24 = vld [vmem:[#allocation7 + $0x8] sm:$0xff]  ;;  %v97_v28 = vld [vmem:[#allocation2 + $0x8] sm:$0xff] }
  0x1f   :  { %642 = vmatpush.bf16.msra.mxu0 %v1629_v8  ;;  %v1633_v25 = vld [vmem:[#allocation7 + $0x48] sm:$0xff]  ;;  %v96_v29 = vld [vmem:[#allocation2] sm:$0xff]  ;;  %v1624_v30 = vld [vmem:[#allocation7] sm:$0xff]  ;;  %v234_v32 = vunpack.c.l.b16 %v97_v28  ;;  %v235_v36 = vunpack.c.h.b16 %v97_v28 }
  0x20   :  { %655 = vmatpush.bf16.msra.mxu1 %v1637_v9  ;;  %v1641_v26 = vld [vmem:[#allocation7 + $0x88] sm:$0xff]  ;;  %v1632_v31 = vld [vmem:[#allocation7 + $0x40] sm:$0xff]  ;;  %v232_v33 = vunpack.c.l.b16 %v96_v29  ;;  %v233_v37 = vunpack.c.h.b16 %v96_v29  ;;  %v1663_v38 = vld [vmem:[#allocation7 + $0x138] sm:$0xff] }
  0x21   :  { %668 = vmatpush.bf16.msra.mxu2 %v1645_v10  ;;  %v1649_v27 = vld [vmem:[#allocation7 + $0xc8] sm:$0xff]  ;;  %v1640_v34 = vld [vmem:[#allocation7 + $0x80] sm:$0xff]  ;;  %v1671_v39 = vld [vmem:[#allocation7 + $0x178] sm:$0xff]  ;;  %v242_v42 = vpack.c.b16 %v234_v32, %v234_v32  ;;  %v243_v44 = vpack.c.b16 %v235_v36, %v235_v36 }
  0x22   :  { %681 = vmatpush.bf16.msra.mxu3 %v1653_v11  ;;  %v1648_v35 = vld [vmem:[#allocation7 + $0xc0] sm:$0xff]  ;;  %v1679_v40 = vld [vmem:[#allocation7 + $0x1b8] sm:$0xff]  ;;  %v240_v43 = vpack.c.b16 %v232_v33, %v232_v33  ;;  %v241_v45 = vpack.c.b16 %v233_v37, %v233_v37  ;;  %v1662_v46 = vld [vmem:[#allocation7 + $0x130] sm:$0xff] }
  0x23   :  { %643 = vmatpush.bf16.msra.mxu0 %v1628_v12  ;;  %v1687_v41 = vld [vmem:[#allocation7 + $0x1f8] sm:$0xff]  ;;  %v1670_v47 = vld [vmem:[#allocation7 + $0x170] sm:$0xff]  ;;  %v1661_v50 = vld [vmem:[#allocation7 + $0x128] sm:$0xff] }
  0x24   :  { %656 = vmatpush.bf16.msra.mxu1 %v1636_v13  ;;  %v1678_v48 = vld [vmem:[#allocation7 + $0x1b0] sm:$0xff]  ;;  %v1669_v51 = vld [vmem:[#allocation7 + $0x168] sm:$0xff]  ;;  %v1660_v54 = vld [vmem:[#allocation7 + $0x120] sm:$0xff] }
  0x25   :  { %669 = vmatpush.bf16.msra.mxu2 %v1644_v14  ;;  %v1686_v49 = vld [vmem:[#allocation7 + $0x1f0] sm:$0xff]  ;;  %v1677_v52 = vld [vmem:[#allocation7 + $0x1a8] sm:$0xff]  ;;  %v1668_v55 = vld [vmem:[#allocation7 + $0x160] sm:$0xff] }
  0x26   :  { %682 = vmatpush.bf16.msra.mxu3 %v1652_v15  ;;  %v1685_v53 = vld [vmem:[#allocation7 + $0x1e8] sm:$0xff]  ;;  %v1676_v56 = vld [vmem:[#allocation7 + $0x1a0] sm:$0xff]  ;;  %v1659_v58 = vld [vmem:[#allocation7 + $0x118] sm:$0xff] }
  0x27   :  { %644 = vmatpush.bf16.msra.mxu0 %v1627_v16  ;;  %v1684_v57 = vld [vmem:[#allocation7 + $0x1e0] sm:$0xff]  ;;  %v1667_v59 = vld [vmem:[#allocation7 + $0x158] sm:$0xff]  ;;  %v1658_v62 = vld [vmem:[#allocation7 + $0x110] sm:$0xff] }
  0x28   :  { %657 = vmatpush.bf16.msra.mxu1 %v1635_v17  ;;  %v1675_v60 = vld [vmem:[#allocation7 + $0x198] sm:$0xff]  ;;  %v1666_v63 = vld [vmem:[#allocation7 + $0x150] sm:$0xff]  ;;  %v1657_v2 = vld [vmem:[#allocation7 + $0x108] sm:$0xff] }
  0x29   :  { %670 = vmatpush.bf16.msra.mxu2 %v1643_v18  ;;  %v1683_v61 = vld [vmem:[#allocation7 + $0x1d8] sm:$0xff]  ;;  %v1674_v0 = vld [vmem:[#allocation7 + $0x190] sm:$0xff]  ;;  %v1665_v3 = vld [vmem:[#allocation7 + $0x148] sm:$0xff] }
  0x2a   :  { %683 = vmatpush.bf16.msra.mxu3 %v1651_v19  ;;  %v1682_v1 = vld [vmem:[#allocation7 + $0x1d0] sm:$0xff]  ;;  %v98_v4 = vld [vmem:[#allocation2 + $0x10] sm:$0xff]  ;;  %v1656_v10 = vld [vmem:[#allocation7 + $0x100] sm:$0xff] }
  0x2b   :  { %645 = vmatpush.bf16.msra.mxu0 %v1626_v20  ;;  %v1673_v5 = vld [vmem:[#allocation7 + $0x188] sm:$0xff]  ;;  %v99_v7 = vld [vmem:[#allocation2 + $0x18] sm:$0xff]  ;;  %v236_v8 = vunpack.c.l.b16 %v98_v4  ;;  %v237_v9 = vunpack.c.h.b16 %v98_v4  ;;  %v1664_v11 = vld [vmem:[#allocation7 + $0x140] sm:$0xff] }
  0x2c   :  { %658 = vmatpush.bf16.msra.mxu1 %v1634_v21  ;;  %v1681_v6 = vld [vmem:[#allocation7 + $0x1c8] sm:$0xff]  ;;  %v238_v12 = vunpack.c.l.b16 %v99_v7  ;;  %v239_v13 = vunpack.c.h.b16 %v99_v7  ;;  %v1672_v14 = vld [vmem:[#allocation7 + $0x180] sm:$0xff]  ;;  %v1706_v28 = vld [vmem:[#allocation10 + $0x74] sm:$0xf] }
  0x2d   :  { %671 = vmatpush.bf16.msra.mxu2 %v1642_v22  ;;  %v1680_v15 = vld [vmem:[#allocation7 + $0x1c0] sm:$0xff]  ;;  %v244_v16 = vpack.c.b16 %v236_v8, %v236_v8  ;;  %v245_v17 = vpack.c.b16 %v237_v9, %v237_v9  ;;  %v1705_v32 = vld [vmem:[#allocation10 + $0x64] sm:$0xf0]  ;;  %v1601_v36 = vld [vmem:[#allocation10 + $0x68] sm:$0xf0] }
  0x2e   :  { %684 = vmatpush.bf16.msra.mxu3 %v1650_v23  ;;  %v246_v18 = vpack.c.b16 %v238_v12, %v238_v12  ;;  %v247_v19 = vpack.c.b16 %v239_v13, %v239_v13  ;;  %v1575_v4 = vld [vmem:[#allocation10 + $0x30] sm:$0xf]  ;;  %v1577_v8 = vld [vmem:[#allocation10 + $0x38] sm:$0xf0]  ;;  %v1696_v12 = vld [vmem:[#allocation10 + $0x24] sm:$0xf] }
  0x2f   :  { %646 = vmatpush.bf16.msra.mxu0 %v1625_v24 }
  0x30   :  { %659 = vmatpush.bf16.msra.mxu1 %v1633_v25 }
  0x31   :  { %672 = vmatpush.bf16.msra.mxu2 %v1641_v26  ;;  %v1607_v26 = vld [vmem:[#allocation10 + $0x70] sm:$0xf] }
  0x32   :  { %685 = vmatpush.bf16.msra.mxu3 %v1649_v27  ;;  %v1707_v27 = vld [vmem:[#allocation10 + $0x74] sm:$0xf0] }
  0x33   :  { %647 = vmatpush.bf16.msra.mxu0 %v1624_v30  ;;  %v1608_v29 = vor.u32 %v1707_v27, %v1607_v26  ;;  %v1609_v30 = vld [vmem:[#allocation10 + $0x78] sm:$0xf0]  ;;  %v1553_v26 = vld [vmem:[#allocation10 + $0x8] sm:$0xf0] }
  0x34   :  { %660 = vmatpush.bf16.msra.mxu1 %v1632_v31  ;;  %v1599_v31 = vld [vmem:[#allocation10 + $0x60] sm:$0xf] }
  0x35   :  { %673 = vmatpush.bf16.msra.mxu2 %v1640_v34  ;;  %v1612_v34 = vor.u32 %v1706_v28, %v1609_v30  ;;  %v744_v28 = vld [vmem:[#allocation5] sm:$0xff]  ;;  %v1902_v30 = vmov 0  }
  0x36   :  { %686 = vmatpush.bf16.msra.mxu3 %v1648_v35  ;;  %648 = vmatmul.bf16.vlgmr.msra.gmra.mxu0 %v240_v43  ;;  %v1704_v35 = vld [vmem:[#allocation10 + $0x64] sm:$0xf] }
  0x37   :  { %692 = vmatpush.bf16.msrb.mxu0 %v1663_v38  ;;  %661 = vmatmul.bf16.vlgmr.msra.gmra.mxu1 %v241_v45  ;;  %v1600_v38 = vor.u32 %v1705_v32, %v1599_v31  ;;  %v1903_v31 = vmov 2  }
  0x38   :  { %705 = vmatpush.bf16.msrb.mxu1 %v1671_v39  ;;  %674 = vmatmul.bf16.vlgmr.msra.gmra.mxu2 %v242_v42  ;;  %v1604_v39 = vor.u32 %v1704_v35, %v1601_v36  ;;  %v1905_v35 = vmov 3  }
  0x39   :  { %718 = vmatpush.bf16.msrb.mxu2 %v1679_v40  ;;  %687 = vmatmul.bf16.vlgmr.msra.gmra.mxu3 %v243_v44 }
  0x3a   :  { %731 = vmatpush.bf16.msrb.mxu3 %v1687_v41  ;;  %1727 = vset.pattern.permute.xlu0 %v1902_v30 }
  0x3b   :  { %693 = vmatpush.bf16.msrb.mxu0 %v1662_v46  ;;  %1729 = vset.pattern.permute.xlu2 %v1903_v31 }
  0x3c   :  { %706 = vmatpush.bf16.msrb.mxu1 %v1670_v47  ;;  %769 = vperm.xlu2 %1729, %v744_v28  }
  0x3d   :  { %719 = vmatpush.bf16.msrb.mxu2 %v1678_v48 }
  0x3e   :  { %732 = vmatpush.bf16.msrb.mxu3 %v1686_v49 }
  0x3f   :  { %694 = vmatpush.bf16.msrb.mxu0 %v1661_v50 }
  0x40   :  { %707 = vmatpush.bf16.msrb.mxu1 %v1669_v51 }
  0x41   :  { %720 = vmatpush.bf16.msrb.mxu2 %v1677_v52 }
  0x42   :  { %733 = vmatpush.bf16.msrb.mxu3 %v1685_v53 }
  0x43   :  { %695 = vmatpush.bf16.msrb.mxu0 %v1660_v54 }
  0x44   :  { %708 = vmatpush.bf16.msrb.mxu1 %v1668_v55  ;;  %1730 = vset.pattern.permute.xlu2 %v1905_v35 }
  0x45   :  { %721 = vmatpush.bf16.msrb.mxu2 %v1676_v56  ;;  %v1591_v56 = vld [vmem:[#allocation10 + $0x50] sm:$0xf]  ;;  %780 = vperm.xlu2 %1730, %v744_v28  }
  0x46   :  { %734 = vmatpush.bf16.msrb.mxu3 %v1684_v57  ;;  %v1703_v57 = vld [vmem:[#allocation10 + $0x54] sm:$0xf0] }
  0x47   :  { %696 = vmatpush.bf16.msrb.mxu0 %v1659_v58  ;;  %v1702_v58 = vld [vmem:[#allocation10 + $0x54] sm:$0xf] }
  0x48   :  { %709 = vmatpush.bf16.msrb.mxu1 %v1667_v59  ;;  %v1592_v59 = vor.u32 %v1703_v57, %v1591_v56 }
  0x49   :  { %722 = vmatpush.bf16.msrb.mxu2 %v1675_v60  ;;  %v1593_v60 = vld [vmem:[#allocation10 + $0x58] sm:$0xf0] }
  0x4a   :  { %735 = vmatpush.bf16.msrb.mxu3 %v1683_v61  ;;  %v1596_v61 = vor.u32 %v1702_v58, %v1593_v60 }
  0x4b   :  { %697 = vmatpush.bf16.msrb.mxu0 %v1658_v62  ;;  %v1583_v62 = vld [vmem:[#allocation10 + $0x40] sm:$0xf] }
  0x4c   :  { %710 = vmatpush.bf16.msrb.mxu1 %v1666_v63  ;;  %v1701_v63 = vld [vmem:[#allocation10 + $0x44] sm:$0xf0] }
  0x4d   :  { %723 = vmatpush.bf16.msrb.mxu2 %v1674_v0  ;;  %v1700_v0 = vld [vmem:[#allocation10 + $0x44] sm:$0xf] }
  0x4e   :  { %736 = vmatpush.bf16.msrb.mxu3 %v1682_v1  ;;  %v1584_v1 = vor.u32 %v1701_v63, %v1583_v62 }
  0x4f   :  { %698 = vmatpush.bf16.msrb.mxu0 %v1657_v2  ;;  %v1585_v2 = vld [vmem:[#allocation10 + $0x48] sm:$0xf0] }
  0x50   :  { %711 = vmatpush.bf16.msrb.mxu1 %v1665_v3  ;;  %v1588_v3 = vor.u32 %v1700_v0, %v1585_v2 }
  0x51   :  { %724 = vmatpush.bf16.msrb.mxu2 %v1673_v5  ;;  %v1699_v5 = vld [vmem:[#allocation10 + $0x34] sm:$0xf0] }
  0x52   :  { %737 = vmatpush.bf16.msrb.mxu3 %v1681_v6  ;;  %v1698_v6 = vld [vmem:[#allocation10 + $0x34] sm:$0xf]  ;;  %v1576_v7 = vor.u32 %v1699_v5, %v1575_v4 }
  0x53   :  { %699 = vmatpush.bf16.msrb.mxu0 %v1656_v10  ;;  %v1580_v9 = vor.u32 %v1698_v6, %v1577_v8  ;;  %v1567_v10 = vld [vmem:[#allocation10 + $0x20] sm:$0xf]  ;;  %v1691_v8 = vld [vmem:[#allocation8 + $0x18] sm:$0xff] }
  0x54   :  { %712 = vmatpush.bf16.msrb.mxu1 %v1664_v11  ;;  %v1697_v11 = vld [vmem:[#allocation10 + $0x24] sm:$0xf0] }
  0x55   :  { %725 = vmatpush.bf16.msrb.mxu2 %v1672_v14  ;;  %v1568_v13 = vor.u32 %v1697_v11, %v1567_v10  ;;  %v1569_v14 = vld [vmem:[#allocation10 + $0x28] sm:$0xf0] }
  0x56   :  { %738 = vmatpush.bf16.msrb.mxu3 %v1680_v15  ;;  %700 = vmatmul.bf16.vlgmr.msrb.gmra.mxu0 %v244_v16  ;;  %v1572_v15 = vor.u32 %v1696_v12, %v1569_v14  ;;  %v1559_v16 = vld [vmem:[#allocation10 + $0x10] sm:$0xf] }
  0x57   :  { %713 = vmatmul.bf16.vlgmr.msrb.gmra.mxu1 %v245_v17  ;;  %v1695_v17 = vld [vmem:[#allocation10 + $0x14] sm:$0xf0]  ;;  %874 = vmatpush.bf16.msra.mxu0 %v1691_v8 }
  0x58   :  { %726 = vmatmul.bf16.vlgmr.msrb.gmra.mxu2 %v246_v18  ;;  %1014 = vmatpush.bf16.msra.mxu1 %v1608_v29  ;;  %v1694_v18 = vld [vmem:[#allocation10 + $0x14] sm:$0xf]  ;;  %v1901_v29 = vmov 1  }
  0x59   :  { %739 = vmatmul.bf16.vlgmr.msrb.gmra.mxu3 %v247_v19  ;;  %1027 = vmatpush.bf16.msra.mxu2 %v1612_v34  ;;  %v1560_v19 = vor.u32 %v1695_v17, %v1559_v16  ;;  %v1904_v34 = vmov 4   ;;  %v1689_v16 = vld [vmem:[#allocation8 + $0x8] sm:$0xff] }
  0x5a   :  { %1728 = vset.pattern.permute.xlu1 %v1901_v29 }
  0x5b   :  { %758 = vperm.xlu1 %1728, %v744_v28  }
  0x5c   :  { %1015 = vmatpush.bf16.msra.mxu1 %v1600_v38 }
  0x5d   :  { %1028 = vmatpush.bf16.msra.mxu2 %v1604_v39 }
  0x60   :  { %1016 = vmatpush.bf16.msra.mxu1 %v1592_v59 }
  0x61   :  { %1029 = vmatpush.bf16.msra.mxu2 %v1596_v61  ;;  %v1909_v61 = vmov 0.0  }
  0x64   :  { %1017 = vmatpush.bf16.msra.mxu1 %v1584_v1 }
  0x65   :  { %1030 = vmatpush.bf16.msra.mxu2 %v1588_v3 }
  0x68   :  { %1018 = vmatpush.bf16.msra.mxu1 %v1576_v7 }
  0x69   :  { %1031 = vmatpush.bf16.msra.mxu2 %v1580_v9 }
  0x6c   :  { %1019 = vmatpush.bf16.msra.mxu1 %v1568_v13  ;;  %v1690_v13 = vld [vmem:[#allocation8 + $0x10] sm:$0xff] }
  0x6d   :  { %1032 = vmatpush.bf16.msra.mxu2 %v1572_v15  ;;  %875 = vmatpush.bf16.msra.mxu0 %v1690_v13 }
  0x70   :  { %1020 = vmatpush.bf16.msra.mxu1 %v1560_v19 }
  0x71   :  { %876 = vmatpush.bf16.msra.mxu0 %v1689_v16 }
  0x96   :  { %v770_v2 = vpop.permute.xlu2 %769 }
  0x9f   :  { %v781_v6 = vpop.permute.xlu2 %780 }
  0xb3   :  { %v649_v20 = vpop.f32.mrf.mxu0 }
  0xb4   :  { %v662_v21 = vpop.f32.mrf.mxu1 }
  0xb5   :  { %v663_v40 = vadd.f32 %v662_v21, %v649_v20  ;;  %v1561_v20 = vld [vmem:[#allocation10 + $0x18] sm:$0xf0] }
  0xb6   :  { %v1564_v21 = vor.u32 %v1694_v18, %v1561_v20 }
  0xb8   :  { %1033 = vmatpush.bf16.msra.mxu2 %v1564_v21  ;;  %v1688_v21 = vld [vmem:[#allocation8] sm:$0xff] }
  0xb9   :  { %877 = vmatpush.bf16.msra.mxu0 %v1688_v21 }
  0xbb   :  { %v675_v22 = vpop.f32.mrf.mxu2  ;;  %v651_v24 = vpop.f32.mrf.mxu0 }
  0xbc   :  { %v688_v23 = vpop.f32.mrf.mxu3  ;;  %v664_v25 = vpop.f32.mrf.mxu1  ;;  %v676_v41 = vadd.f32 %v675_v22, %v663_v40  ;;  %v1551_v22 = vld [vmem:[#allocation10] sm:$0xf]  ;;  %v1692_v24 = vld [vmem:[#allocation10 + $0x4] sm:$0xf]  ;;  %v1906_v40 = vmov 5  }
  0xbd   :  { %v1556_v27 = vor.u32 %v1692_v24, %v1553_v26  ;;  %1732 = vset.pattern.permute.xlu2 %v1906_v40 }
  0xbe   :  { %v689_v42 = vadd.f32 %v688_v23, %v676_v41  ;;  %v1693_v23 = vld [vmem:[#allocation10 + $0x4] sm:$0xf0]  ;;  %802 = vperm.xlu2 %1732, %v744_v28  }
  0xbf   :  { %v1552_v25 = vor.u32 %v1693_v23, %v1551_v22  ;;  %1034 = vmatpush.bf16.msra.mxu2 %v1556_v27 }
  0xc1   :  { %1021 = vmatpush.bf16.msra.mxu1 %v1552_v25 }
  0xc3   :  { %v677_v33 = vpop.f32.mrf.mxu2 }
  0xc4   :  { %v690_v37 = vpop.f32.mrf.mxu3 }
  0xcd   :  { %v759_v59 = vpop.permute.xlu1 %758 }
  0xd3   :  { %v701_v43 = vpop.f32.mrf.mxu0 }
  0xd4   :  { %v714_v44 = vpop.f32.mrf.mxu1  ;;  %v702_v45 = vadd.f32 %v701_v43, %v689_v42 }
  0xd6   :  { %v715_v46 = vadd.f32 %v714_v44, %v702_v45 }
  0xdb   :  { %v727_v47 = vpop.f32.mrf.mxu2  ;;  %v703_v50 = vpop.f32.mrf.mxu0 }
  0xdc   :  { %v740_v48 = vpop.f32.mrf.mxu3  ;;  %v728_v49 = vadd.f32 %v727_v47, %v715_v46  ;;  %v716_v51 = vpop.f32.mrf.mxu1  ;;  %v1907_v46 = vmov 6   ;;  %v745_v47 = vlaneseq }
  0xdd   :  { %1733 = vset.pattern.permute.xlu1 %v1907_v46 }
  0xde   :  { %v1956_v52 = vadd.f32 %v740_v48, %v728_v49  ;;  %v1964_v48 = vand.u32 127, %v745_v47  ;;  %v1908_v49 = vmov 7  }
  0xdf   :  { %1734 = vset.pattern.permute.xlu2 %v1908_v49 }
  0xe0   :  { %v883_v53 = vmul.f32 %v1956_v52, %v1956_v52  ;;  %vm1112_vm3 = vcmp.ge.s32.totalorder %v1964_v48, 64  ;;  %vm1114_vm4 = vcmp.lt.s32.totalorder %v1964_v48, 72  ;;  %vm1048_vm6 = vcmp.lt.s32.totalorder %v1964_v48, 35 }
  0xe1   :  { %vm1116_vm5 = vmand %vm1112_vm3, %vm1114_vm4  ;;  %vm760_vm8 = vcmp.eq.s32.totalorder %v1964_v48, %v759_v59  ;;  %vm771_vm10 = vcmp.eq.s32.totalorder %v1964_v48, %v770_v2  ;;  %vm782_vm11 = vcmp.eq.s32.totalorder %v1964_v48, %v781_v6 }
  0xe2   :  { %884 = vadd.xlane.f32.xlu0 %v883_v53  ;;  %v1525_v62 = vsel %vm760_vm8, 1.0, %v1909_v61  ;;  %v1526_v4 = vsel %vm771_vm10, 1.0, %v1909_v61  ;;  %v1527_v10 = vsel %vm782_vm11, 1.0, %v1909_v61 }
  0xe3   :  { %v729_v54 = vpop.f32.mrf.mxu2 }
  0xe4   :  { %v742_v55 = vpop.f32.mrf.mxu3  ;;  %v1976_v54 = vadd.s32 128, %v1964_v48 }
  0xe6   :  { %vm1183_vm7 = vcmp.lt.s32.totalorder %v1976_v54, 161 }
  0xf6   :  { %748 = vperm.xlu0 %1727, %v744_v28  }
  0xfe   :  { %1731 = vset.pattern.permute.xlu0 %v1904_v34 }
  0xff   :  { %791 = vperm.xlu0 %1731, %v744_v28  }
 0x107   :  { %1735 = vset.pattern.permute.xlu0 %v1908_v49 }
 0x118   :  { %v803_v12 = vpop.permute.xlu2 %802 }
 0x155   :  { %v885_v32 = vpop.xlane.xlu0 %884 }
 0x156   :  { %v892_v33 = vmax.f32 %v885_v32, 1e-12 }
 0x158   :  { %1736 = vrsqrt.f32 %v892_v33  ;;  %vm899_vm1 = vweird.f32 %v892_v33 }
 0x15e   :  { %v1737_v36 = vpop.eup %1736 }
 0x15f   :  { %v894_v37 = vmul.f32 %v1737_v36, %v892_v33  ;;  %vm900_vm0 = vweird.f32 %v1737_v36 }
 0x160   :  { %vm901_vm2 = vmor %vm899_vm1, %vm900_vm0 }
 0x161   :  { %v895_v38 = vmul.f32 %v1737_v36, %v894_v37 }
 0x163   :  { %v896_v39 = vmul.f32 0.5, %v895_v38 }
 0x165   :  { %v897_v41 = vsub.f32 1.5, %v896_v39 }
 0x167   :  { %v898_v42 = vmul.f32 %v1737_v36, %v897_v41 }
 0x168   :  { %v749_v60 = vpop.permute.xlu0 %748 }
 0x169   :  { %v1960_v43 = vsel %vm901_vm2, %v1737_v36, %v898_v42  ;;  %vm750_vm9 = vcmp.eq.s32.totalorder %v1964_v48, %v749_v60 }
 0x16a   :  { %v916_v44 = vmul.f32 %v1960_v43, %v1956_v52  ;;  %v1524_v63 = vsel %vm750_vm9, 1.0, %v1909_v61  ;;  %vm866_vm9 = vcmask 523264  }
 0x16b   :  { %v766_v0 = vadd.f32 %v1525_v62, %v1524_v63 }
 0x16c   :  { %v917_v45 = vpack.c.bf16 %v916_v44, %v916_v44 }
 0x16d   :  { %v767_v1 = vpack.c.bf16 %v766_v0, %v766_v0 }
 0x16e   :  { %1022 = vmatmul.bf16.vlgmr.msra.gmra.mxu1 %v917_v45  ;;  %1035 = vmatmul.bf16.vlgmr.msra.gmra.mxu2 %v917_v45 }
 0x16f   :  { %v775_v3 = vunpack.c.l.bf16 %v767_v1 }
 0x171   :  { %v777_v5 = vadd.f32 %v1526_v4, %v775_v3  ;;  %v792_v14 = vpop.permute.xlu0 %791 }
 0x172   :  { %vm793_vm12 = vcmp.eq.s32.totalorder %v1964_v48, %v792_v14 }
 0x173   :  { %v778_v7 = vpack.c.bf16 %v777_v5, %v777_v5  ;;  %v1528_v18 = vsel %vm793_vm12, 1.0, %v1909_v61 }
 0x175   :  { %v786_v9 = vunpack.c.l.bf16 %v778_v7 }
 0x177   :  { %v788_v11 = vadd.f32 %v1527_v10, %v786_v9 }
 0x179   :  { %v789_v15 = vpack.c.bf16 %v788_v11, %v788_v11 }
 0x17b   :  { %v797_v17 = vunpack.c.l.bf16 %v789_v15 }
 0x17d   :  { %v799_v27 = vadd.f32 %v1528_v18, %v797_v17 }
 0x17f   :  { %v800_v34 = vpack.c.bf16 %v799_v27, %v799_v27 }
 0x181   :  { %v808_v38 = vunpack.c.l.bf16 %v800_v34 }
 0x1eb   :  { %v1023_v50 = vpop.f32.mrf.mxu1 }
 0x1ec   :  { %v1969_v51 = vsel %vm1116_vm5, %v1023_v50, -inf  ;;  %v1971_v53 = vsel %vm1048_vm6, %v1023_v50, -inf  ;;  %vm804_vm5 = vcmp.eq.s32.totalorder %v1964_v48, %v803_v12 }
 0x1ed   :  { %1121 = vmax.xlane.f32.xlu2 %v1969_v51  ;;  %1055 = vmax.xlane.f32.xlu1 %v1971_v53  ;;  %v1529_v40 = vsel %vm804_vm5, 1.0, %v1909_v61 }
 0x1ee   :  { %v810_v42 = vadd.f32 %v1529_v40, %v808_v38 }
 0x1f0   :  { %v811_v44 = vpack.c.bf16 %v810_v42, %v810_v42 }
 0x1f1   :  { %v1036_v55 = vpop.f32.mrf.mxu2 }
 0x1f2   :  { %v1979_v57 = vsel %vm1183_vm7, %v1036_v55, -inf  ;;  %v819_v47 = vunpack.c.l.bf16 %v811_v44 }
 0x1f3   :  { %v1025_v56 = vpop.f32.mrf.mxu1 }
 0x1f5   :  { %1189 = vmax.xlane.f32.xlu2 %v1979_v57 }
 0x1f9   :  { %v1038_v58 = vpop.f32.mrf.mxu2 }
 0x206   :  { %813 = vperm.xlu1 %1733, %v744_v28  }
 0x20d   :  { %824 = vperm.xlu2 %1734, %v744_v28  }
 0x260   :  { %v1122_v19 = vpop.xlane.xlu2 %1121  ;;  %v1056_v20 = vpop.xlane.xlu1 %1055 }
 0x261   :  { %vm1123_vm13 = vcmp.eq.f32.partialorder %v1969_v51, %v1122_v19  ;;  %vm1616_vm14 = vcmp.eq.f32.partialorder %v1122_v19, -inf  ;;  %vm1057_vm15 = vcmp.eq.f32.partialorder %v1971_v53, %v1056_v20  ;;  %vm1614_vm0 = vcmp.eq.f32.partialorder %v1056_v20, -inf }
 0x262   :  { %v1125_v22 = vsel %vm1123_vm13, %v1964_v48, 1000000000  ;;  %v1126_v23 = vsel %vm1616_vm14, %v1976_v54, 1000000000  ;;  %v1059_v24 = vsel %vm1057_vm15, %v1964_v48, 1000000000 }
 0x263   :  { %vm1127_vm1 = vcmp.lt.s32.totalorder %v1125_v22, %v1126_v23  ;;  %v1060_v25 = vsel %vm1614_vm0, %v1976_v54, 1000000000 }
 0x264   :  { %vm1061_vm2 = vcmp.lt.s32.totalorder %v1059_v24, %v1060_v25  ;;  %v1128_v26 = vsel %vm1127_vm1, %v1125_v22, %v1126_v23 }
 0x265   :  { %v1130_v28 = vshra.s32 %v1128_v26, 16  ;;  %v1062_v29 = vsel %vm1061_vm2, %v1059_v24, %v1060_v25  ;;  %v1129_v62 = vand.u32 65535, %v1128_v26 }
 0x266   :  { %v1064_v30 = vshra.s32 %v1062_v29, 16  ;;  %v1063_v63 = vand.u32 65535, %v1062_v29 }
 0x267   :  { %v1132_v31 = vcvt.s32.f32 %v1130_v28  ;;  %v1131_v1 = vcvt.s32.f32 %v1129_v62 }
 0x268   :  { %v1190_v32 = vpop.xlane.xlu2 %1189  ;;  %v1066_v33 = vcvt.s32.f32 %v1064_v30  ;;  %v1065_v3 = vcvt.s32.f32 %v1063_v63 }
 0x269   :  { %vm1620_vm3 = vcmp.eq.f32.partialorder %v1190_v32, -inf  ;;  %vm1192_vm4 = vcmp.eq.f32.partialorder %v1979_v57, %v1190_v32  ;;  %1133 = vmin.xlane.f32.xlu2 %v1132_v31 }
 0x26a   :  { %v1193_v35 = vsel %vm1620_vm3, %v1964_v48, 1000000000  ;;  %v1194_v36 = vsel %vm1192_vm4, %v1976_v54, 1000000000  ;;  %1067 = vmin.xlane.f32.xlu0 %v1066_v33 }
 0x26b   :  { %vm1195_vm6 = vcmp.lt.s32.totalorder %v1193_v35, %v1194_v36 }
 0x26c   :  { %v1196_v37 = vsel %vm1195_vm6, %v1193_v35, %v1194_v36 }
 0x26d   :  { %v1198_v39 = vshra.s32 %v1196_v37, 16  ;;  %v1197_v6 = vand.u32 65535, %v1196_v37 }
 0x26f   :  { %v1200_v41 = vcvt.s32.f32 %v1198_v39  ;;  %v1199_v8 = vcvt.s32.f32 %v1197_v6 }
 0x270   :  { %v825_v46 = vpop.permute.xlu2 %824 }
 0x271   :  { %1201 = vmin.xlane.f32.xlu1 %v1200_v41  ;;  %vm826_vm8 = vcmp.eq.s32.totalorder %v1964_v48, %v825_v46 }
 0x272   :  { %v1531_v56 = vsel %vm826_vm8, 1.0, %v1909_v61 }
 0x278   :  { %v814_v45 = vpop.permute.xlu1 %813 }
 0x279   :  { %vm815_vm7 = vcmp.eq.s32.totalorder %v1964_v48, %v814_v45 }
 0x27a   :  { %v1530_v49 = vsel %vm815_vm7, 1.0, %v1909_v61 }
 0x27b   :  { %v821_v50 = vadd.f32 %v1530_v49, %v819_v47 }
 0x27d   :  { %v822_v55 = vpack.c.bf16 %v821_v50, %v821_v50 }
 0x27f   :  { %v830_v58 = vunpack.c.l.bf16 %v822_v55 }
 0x281   :  { %v832_v59 = vadd.f32 %v1531_v56, %v830_v58 }
 0x283   :  { %v833_v60 = vpack.c.bf16 %v832_v59, %v832_v59 }
 0x285   :  { %1548 = vmatmul.msk.bf16.vlgmr.msra.gmra.mxu0 %vm866_vm9, %v833_v60 }
 0x2dc   :  { %v1134_v0 = vpop.xlane.xlu2 %1133 }
 0x2dd   :  { %v1068_v2 = vpop.xlane.xlu0 %1067  ;;  %vm1135_vm10 = vcmp.eq.f32.partialorder %v1132_v31, %v1134_v0  ;;  %v1140_v12 = vcvt.f32.s32 %v1134_v0 }
 0x2de   :  { %v1136_v4 = vsel %vm1135_vm10, %v1131_v1, inf  ;;  %vm1069_vm11 = vcmp.eq.f32.partialorder %v1066_v33, %v1068_v2  ;;  %v1074_v13 = vcvt.f32.s32 %v1068_v2 }
 0x2df   :  { %1137 = vmin.xlane.f32.xlu0 %v1136_v4  ;;  %v1070_v5 = vsel %vm1069_vm11, %v1065_v3, inf  ;;  %v1141_v15 = vshll.u32 %v1140_v12, 16 }
 0x2e0   :  { %1071 = vmin.xlane.f32.xlu2 %v1070_v5  ;;  %v1075_v18 = vshll.u32 %v1074_v13, 16 }
 0x2e4   :  { %v1202_v7 = vpop.xlane.xlu1 %1201 }
 0x2e5   :  { %vm1203_vm12 = vcmp.eq.f32.partialorder %v1200_v41, %v1202_v7  ;;  %v1208_v22 = vcvt.f32.s32 %v1202_v7 }
 0x2e6   :  { %v1204_v9 = vsel %vm1203_vm12, %v1199_v8, inf }
 0x2e7   :  { %v1209_v26 = vshll.u32 %v1208_v22, 16 }
 0x2e8   :  { %1205 = vmin.xlane.f32.xlu2 %v1204_v9 }
 0x302   :  { %v879_v10 = vpop.f32.mrf.mxu0 }
 0x303   :  { %v889_v45 = vmul.f32 %v879_v10, %v1956_v52  ;;  %v886_v47 = vmul.f32 %v879_v10, %v879_v10 }
 0x30a   :  { %v881_v11 = vpop.f32.mrf.mxu0 }
 0x352   :  { %v1138_v14 = vpop.xlane.xlu0 %1137 }
 0x353   :  { %v1072_v16 = vpop.xlane.xlu2 %1071  ;;  %v1139_v17 = vcvt.f32.s32 %v1138_v14 }
 0x354   :  { %v1073_v19 = vcvt.f32.s32 %v1072_v16 }
 0x355   :  { %v2007_v20 = vadd.s32 %v1141_v15, %v1139_v17 }
 0x356   :  { %v2009_v21 = vadd.s32 %v1075_v18, %v1073_v19 }
 0x357   :  { %vm1143_vm13 = vcmp.eq.s32.totalorder %v1964_v48, %v2007_v20 }
 0x358   :  { %vm1077_vm14 = vcmp.eq.s32.totalorder %v1964_v48, %v2009_v21  ;;  %v1145_v23 = vsel %vm1143_vm13, -inf, %v1969_v51 }
 0x359   :  { %v1079_v24 = vsel %vm1077_vm14, -inf, %v1971_v53  ;;  %1148 = vmax.xlane.f32.xlu1 %v1145_v23 }
 0x35a   :  { %1082 = vmax.xlane.f32.xlu0 %v1079_v24 }
 0x35b   :  { %v1206_v25 = vpop.xlane.xlu2 %1205 }
 0x35c   :  { %v1207_v27 = vcvt.f32.s32 %v1206_v25  ;;  %v1618_v25 = vadd.s32 4294967232, %v2007_v20 }
 0x35e   :  { %v2017_v28 = vadd.s32 %v1209_v26, %v1207_v27 }
 0x360   :  { %vm1212_vm15 = vcmp.eq.s32.totalorder %v1976_v54, %v2017_v28  ;;  %v1622_v27 = vadd.s32 4294967168, %v2017_v28 }
 0x361   :  { %v1214_v29 = vsel %vm1212_vm15, -inf, %v1979_v57 }
 0x362   :  { %1216 = vmax.xlane.f32.xlu2 %v1214_v29 }
 0x3cc   :  { %v1149_v30 = vpop.xlane.xlu1 %1148 }
 0x3cd   :  { %vm1150_vm0 = vcmp.eq.f32.partialorder %v1145_v23, %v1149_v30  ;;  %vm1617_vm1 = vcmp.eq.f32.partialorder %v1149_v30, -inf  ;;  %v1083_v31 = vpop.xlane.xlu0 %1082 }
 0x3ce   :  { %v1152_v51 = vsel %vm1150_vm0, %v1964_v48, 1000000000  ;;  %v1153_v53 = vsel %vm1617_vm1, %v1976_v54, 1000000000  ;;  %vm1084_vm2 = vcmp.eq.f32.partialorder %v1079_v24, %v1083_v31  ;;  %vm1615_vm3 = vcmp.eq.f32.partialorder %v1083_v31, -inf }
 0x3cf   :  { %vm1154_vm4 = vcmp.lt.s32.totalorder %v1152_v51, %v1153_v53  ;;  %v1086_v32 = vsel %vm1084_vm2, %v1964_v48, 1000000000  ;;  %v1087_v33 = vsel %vm1615_vm3, %v1976_v54, 1000000000  ;;  %v1104_v24 = vcvt.s32.f32 %v2009_v21 }
 0x3d0   :  { %vm1088_vm5 = vcmp.lt.s32.totalorder %v1086_v32, %v1087_v33  ;;  %v1155_v34 = vsel %vm1154_vm4, %v1152_v51, %v1153_v53  ;;  %vm1044_vm0 = vcmp.eq.s32.totalorder %v1964_v48, 0  ;;  %vm1108_vm1 = vcmp.eq.s32.totalorder %v1964_v48, 1 }
 0x3d1   :  { %v1157_v35 = vshra.s32 %v1155_v34, 16  ;;  %v1089_v57 = vsel %vm1088_vm5, %v1086_v32, %v1087_v33  ;;  %v1156_v49 = vand.u32 65535, %v1155_v34  ;;  %v1171_v53 = vcvt.s32.f32 %v1618_v25 }
 0x3d2   :  { %v1091_v36 = vshra.s32 %v1089_v57, 16  ;;  %v1090_v50 = vand.u32 65535, %v1089_v57  ;;  %vm1110_vm2 = vcmp.eq.s32.totalorder %v1964_v48, 2  ;;  %vm1176_vm3 = vcmp.eq.s32.totalorder %v1964_v48, 3 }
 0x3d3   :  { %v1159_v37 = vcvt.s32.f32 %v1157_v35  ;;  %v1158_v56 = vcvt.s32.f32 %v1156_v49  ;;  %vm1178_vm4 = vcmp.eq.s32.totalorder %v1964_v48, 4  ;;  %vm1244_vm5 = vcmp.eq.s32.totalorder %v1964_v48, 5 }
 0x3d4   :  { %v1093_v38 = vcvt.s32.f32 %v1091_v36  ;;  %v1092_v59 = vcvt.s32.f32 %v1090_v50 }
 0x3d5   :  { %v1217_v39 = vpop.xlane.xlu2 %1216  ;;  %1160 = vmin.xlane.f32.xlu1 %v1159_v37 }
 0x3d6   :  { %vm1621_vm6 = vcmp.eq.f32.partialorder %v1217_v39, -inf  ;;  %vm1219_vm7 = vcmp.eq.f32.partialorder %v1214_v29, %v1217_v39  ;;  %1094 = vmin.xlane.f32.xlu0 %v1093_v38 }
 0x3d7   :  { %v1220_v40 = vsel %vm1621_vm6, %v1964_v48, 1000000000  ;;  %v1221_v41 = vsel %vm1219_vm7, %v1976_v54, 1000000000  ;;  %vm1246_vm6 = vcmp.eq.s32.totalorder %v1964_v48, 6 }
 0x3d8   :  { %vm1222_vm8 = vcmp.lt.s32.totalorder %v1220_v40, %v1221_v41 }
 0x3d9   :  { %v1223_v42 = vsel %vm1222_vm8, %v1220_v40, %v1221_v41 }
 0x3da   :  { %v1225_v44 = vshra.s32 %v1223_v42, 16  ;;  %v1224_v62 = vand.u32 65535, %v1223_v42 }
 0x3dc   :  { %v1227_v46 = vcvt.s32.f32 %v1225_v44  ;;  %v1226_v52 = vcvt.s32.f32 %v1224_v62 }
 0x3dd   :  { %890 = vadd.xlane.f32.xlu1 %v889_v45 }
 0x3de   :  { %1228 = vmin.xlane.f32.xlu2 %v1227_v46  ;;  %887 = vadd.xlane.f32.xlu0 %v886_v47 }
 0x448   :  { %v1161_v55 = vpop.xlane.xlu1 %1160 }
 0x449   :  { %v1095_v58 = vpop.xlane.xlu0 %1094  ;;  %vm1162_vm9 = vcmp.eq.f32.partialorder %v1159_v37, %v1161_v55  ;;  %v1167_v13 = vcvt.f32.s32 %v1161_v55 }
 0x44a   :  { %v1163_v60 = vsel %vm1162_vm9, %v1158_v56, inf  ;;  %vm1096_vm10 = vcmp.eq.f32.partialorder %v1093_v38, %v1095_v58  ;;  %v1101_v14 = vcvt.f32.s32 %v1095_v58 }
 0x44b   :  { %1164 = vmin.xlane.f32.xlu0 %v1163_v60  ;;  %v1097_v54 = vsel %vm1096_vm10, %v1092_v59, inf  ;;  %v1168_v16 = vshll.u32 %v1167_v13, 16 }
 0x44c   :  { %1098 = vmin.xlane.f32.xlu2 %v1097_v54  ;;  %v1102_v19 = vshll.u32 %v1101_v14, 16 }
 0x450   :  { %v891_v9 = vpop.xlane.xlu1 %890 }
 0x451   :  { %v1229_v63 = vpop.xlane.xlu2 %1228  ;;  %v888_v1 = vpop.xlane.xlu0 %887  ;;  %v914_v11 = vmul.f32 %v1960_v43, %v891_v9 }
 0x452   :  { %vm1230_vm11 = vcmp.eq.f32.partialorder %v1227_v46, %v1229_v63  ;;  %v903_v2 = vmax.f32 %v888_v1, 1e-12  ;;  %v1235_v31 = vcvt.f32.s32 %v1229_v63 }
 0x453   :  { %v1231_v0 = vsel %vm1230_vm11, %v1226_v52, inf }
 0x454   :  { %1232 = vmin.xlane.f32.xlu1 %v1231_v0  ;;  %1738 = vrsqrt.f32 %v903_v2  ;;  %vm910_vm13 = vweird.f32 %v903_v2  ;;  %v1236_v57 = vshll.u32 %v1235_v31, 16 }
 0x45a   :  { %v1739_v3 = vpop.eup %1738 }
 0x45b   :  { %v905_v4 = vmul.f32 %v1739_v3, %v903_v2  ;;  %vm911_vm12 = vweird.f32 %v1739_v3 }
 0x45c   :  { %vm912_vm14 = vmor %vm910_vm13, %vm911_vm12 }
 0x45d   :  { %v906_v5 = vmul.f32 %v1739_v3, %v905_v4 }
 0x45f   :  { %v907_v6 = vmul.f32 0.5, %v906_v5 }
 0x461   :  { %v908_v7 = vsub.f32 1.5, %v907_v6 }
 0x463   :  { %v909_v8 = vmul.f32 %v1739_v3, %v908_v7 }
 0x465   :  { %v913_v10 = vsel %vm912_vm14, %v1739_v3, %v909_v8 }
 0x466   :  { %v915_v12 = vmul.f32 %v914_v11, %v913_v10 }
 0x468   :  { %vm1041_vm15 = vcmp.lt.f32.partialorder %v915_v12, 0.3  ;;  %v1045_v21 = vsel %vm1044_vm0, %v915_v12, 0.0 }
 0x469   :  { %v1613_v22 = vsel %vm1041_vm15, 1.0, %v1909_v61  ;;  %v1239_v61 = vcvt.s32.f32 %v1622_v27 }
 0x46a   :  { %v1105_v30 = vmul.f32 %v1613_v22, %v1104_v24  ;;  %v1172_v34 = vmul.f32 %v1613_v22, %v1171_v53 }
 0x46b   :  { %v1240_v39 = vmul.f32 %v1613_v22, %v1239_v61 }
 0x46c   :  { %v1109_v28 = vsel %vm1108_vm1, %v1105_v30, %v1045_v21 }
 0x4be   :  { %v1165_v15 = vpop.xlane.xlu0 %1164 }
 0x4bf   :  { %v1166_v17 = vcvt.f32.s32 %v1165_v15  ;;  %v1099_v18 = vpop.xlane.xlu2 %1098 }
 0x4c0   :  { %v1100_v23 = vcvt.f32.s32 %v1099_v18 }
 0x4c1   :  { %v1169_v26 = vadd.s32 %v1168_v16, %v1166_v17 }
 0x4c2   :  { %v1103_v43 = vadd.s32 %v1102_v19, %v1100_v23 }
 0x4c3   :  { %v1619_v29 = vadd.s32 4294967232, %v1169_v26 }
 0x4c4   :  { %v1106_v51 = vcvt.s32.f32 %v1103_v43 }
 0x4c5   :  { %v1174_v32 = vcvt.s32.f32 %v1619_v29 }
 0x4c6   :  { %v1107_v20 = vmul.f32 %v1613_v22, %v1106_v51 }
 0x4c7   :  { %v1175_v33 = vmul.f32 %v1613_v22, %v1174_v32  ;;  %v1233_v35 = vpop.xlane.xlu1 %1232 }
 0x4c8   :  { %v1111_v36 = vsel %vm1110_vm2, %v1107_v20, %v1109_v28  ;;  %v1234_v37 = vcvt.f32.s32 %v1233_v35 }
 0x4c9   :  { %v1177_v38 = vsel %vm1176_vm3, %v1172_v34, %v1111_v36 }
 0x4ca   :  { %v1237_v40 = vadd.s32 %v1236_v57, %v1234_v37  ;;  %v1179_v41 = vsel %vm1178_vm4, %v1175_v33, %v1177_v38 }
 0x4cb   :  { %v1245_v42 = vsel %vm1244_vm5, %v1240_v39, %v1179_v41 }
 0x4cc   :  { %v1623_v44 = vadd.s32 4294967168, %v1237_v40 }
 0x4ce   :  { %v1242_v45 = vcvt.s32.f32 %v1623_v44 }
 0x4d0   :  { %v1243_v46 = vmul.f32 %v1613_v22, %v1242_v45 }
 0x4d2   :  { %v1247_v47 = vsel %vm1246_vm6, %v1243_v46, %v1245_v42 }
 0x4d3   :  { %1248 = vst [vmem:[#allocation11] sm:$0xff] %v1247_v47 }
 0x4d4   :  { %1259 = dma.vmem_to_hbm [thread:$0]  %s1255_s4, 128, %s1257_s21, [#allocation4]  }
 0x4d5   :  { %1890 = dma.done.wait [#allocation4], 128  }
 0x4d6   :  { %1891 = vsyncadd [#allocation4], 4294967168 }
 0x4d7   :  { %1264 = vsyncpa [#allocation3], 1 }
 0x4d8   :  { %1265 = vsyncpa [#allocation6], 1 }
 0x4d9   :  { %1266 = vsyncpa [#allocation9], 1 }
 0x4da   :  { %1267 = vsyncpa [#allocation4], 1 }

// kernel: _forward_call.1
= control target key start
LH: loop header
LB: loop body
LE: loop exit
PB: predicated region body
PF: predicated region fallthrough
CT: control target
= control target key end

     0   :  { %10 = vsyncpa [#allocation3], 0  ;;  %s2044_s0 = inlined_call_operand.hbm [shape: bf16[8,1024], index: 0, kind: input, shape index: {}]   ;;  %s2045_s1 = inlined_call_operand.hbm [shape: s32[8,8], index: 1, kind: input, shape index: {}]   ;;  %s2046_s2 = inlined_call_operand.hbm [shape: bf16[1024,128], index: 2, kind: input, shape index: {}]   ;;  %s2047_s3 = inlined_call_operand.hbm [shape: bf16[64,128], index: 3, kind: input, shape index: {}]   ;;  %s2048_s4 = inlined_call_operand.hbm [shape: bf16[128,256], index: 4, kind: input, shape index: {}]   ;;  %s2049_s5 = inlined_call_operand.hbm [shape: f32[8,128], index: 5, kind: output, shape index: {}]  }
   0x1   :  { %11 = vsyncpa [#allocation6], 0 }
   0x2   :  { %12 = vsyncpa [#allocation9], 0  ;;  %s30_s20 = sshll.u32 %s2045_s1, 4  ;;  %s31_s20 = int_to_ptr.hbm [resolvable:$true] %s30_s20 }
   0x3   :  { %13 = vsyncpa [#allocation4], 0  ;;  %s1892_s21 = smov [#allocation5]   ;;  %s53_s25 = sshll.u32 %s2047_s3, 4  ;;  %s54_s25 = int_to_ptr.hbm [resolvable:$true] %s53_s25 }
   0x4   :  { %s32_s22 = sshll.u32 %s1892_s21, 4  ;;  %s1893_s26 = smov [#allocation8]   ;;  %s33_s22 = int_to_ptr.vmem [resolvable:$true] %s32_s22 }
   0x5   :  { %35 = dma.hbm_to_vmem [thread:$0]  %s31_s20, 128, %s33_s22, [#allocation6]  }
   0x6   :  { %s55_s27 = sshll.u32 %s1893_s26, 4  ;;  %s19_s30 = sshll.u32 %s2044_s0, 4  ;;  %s56_s27 = int_to_ptr.vmem [resolvable:$true] %s55_s27  ;;  %s20_s30 = int_to_ptr.hbm [resolvable:$true] %s19_s30 }
   0x7   :  { %s1894_s1 = smov 64   ;;  %s1895_s6 = smov 4  }
   0x8   :  { %61 = dma.hbm_to_vmem [thread:$0]  %s54_s25, 512, %s56_s27, [#allocation9], %s1894_s1, %s1894_s1, %s1895_s6  }
   0x9   :  { %s40_s9 = sshll.u32 %s2046_s2, 4  ;;  %s1896_s10 = smov [#allocation2]   ;;  %s41_s9 = int_to_ptr.hbm [resolvable:$true] %s40_s9 }
   0xa   :  { %s21_s11 = sshll.u32 %s1896_s10, 4  ;;  %s1897_s3 = smov [#allocation7]   ;;  %s22_s11 = int_to_ptr.vmem [resolvable:$true] %s21_s11 }
   0xb   :  { %24 = dma.hbm_to_vmem [thread:$0]  %s20_s30, 512, %s22_s11, [#allocation3]  }
   0xc   :  { %s42_s12 = sshll.u32 %s1897_s3, 4  ;;  %s66_s0 = sshll.u32 %s2048_s4, 4  ;;  %s43_s12 = int_to_ptr.vmem [resolvable:$true] %s42_s12  ;;  %s67_s0 = int_to_ptr.hbm [resolvable:$true] %s66_s0 }
   0xd   :  { %48 = dma.hbm_to_vmem [thread:$0]  %s41_s9, 8192, %s43_s12, [#allocation6], %s1894_s1, %s1894_s1, %s1895_s6  }
   0xe   :  { %s1898_s15 = smov [#allocation10]   ;;  %s1899_s17 = smov 128  }
   0xf   :  { %s68_s16 = sshll.u32 %s1898_s15, 4  ;;  %s1900_s18 = smov 8   ;;  %s69_s16 = int_to_ptr.vmem [resolvable:$true] %s68_s16 }
  0x10   :  { %74 = dma.hbm_to_vmem [thread:$0]  %s67_s0, 2048, %s69_s16, [#allocation9], %s1899_s17, %s1899_s17, %s1900_s18  }
  0x11   :  { %1884 = dma.done.wait [#allocation3], 512  }
  0x12   :  { %1885 = vsyncadd [#allocation3], 4294966784 }
  0x13   :  { %1886 = dma.done.wait [#allocation6], 8320  }
  0x14   :  { %1887 = vsyncadd [#allocation6], 4294958976 }
  0x15   :  { %1888 = dma.done.wait [#allocation9], 2560  }
  0x16   :  { %1889 = vsyncadd [#allocation9], 4294964736  ;;  %v1631_v0 = vld [vmem:[#allocation7 + $0x38] sm:$0xff]  ;;  %v1630_v4 = vld [vmem:[#allocation7 + $0x30] sm:$0xff]  ;;  %s1910_s2 = smov [#allocation11]   ;;  %s1256_s21 = sshll.u32 %s2049_s5, 4  ;;  %s1257_s21 = int_to_ptr.hbm [resolvable:$true] %s1256_s21 }
  0x17   :  { %v1639_v1 = vld [vmem:[#allocation7 + $0x78] sm:$0xff]  ;;  %640 = vmatpush.bf16.msra.mxu0 %v1631_v0  ;;  %v1638_v5 = vld [vmem:[#allocation7 + $0x70] sm:$0xff]  ;;  %v1629_v8 = vld [vmem:[#allocation7 + $0x28] sm:$0xff]  ;;  %s1254_s4 = sshll.u32 %s1910_s2, 4  ;;  %s1255_s4 = int_to_ptr.vmem [resolvable:$true] %s1254_s4 }
  0x18   :  { %v1647_v2 = vld [vmem:[#allocation7 + $0xb8] sm:$0xff]  ;;  %653 = vmatpush.bf16.msra.mxu1 %v1639_v1  ;;  %v1646_v6 = vld [vmem:[#allocation7 + $0xb0] sm:$0xff]  ;;  %v1637_v9 = vld [vmem:[#allocation7 + $0x68] sm:$0xff] }
  0x19   :  { %v1655_v3 = vld [vmem:[#allocation7 + $0xf8] sm:$0xff]  ;;  %666 = vmatpush.bf16.msra.mxu2 %v1647_v2  ;;  %v1654_v7 = vld [vmem:[#allocation7 + $0xf0] sm:$0xff]  ;;  %v1645_v10 = vld [vmem:[#allocation7 + $0xa8] sm:$0xff] }
  0x1a   :  { %679 = vmatpush.bf16.msra.mxu3 %v1655_v3  ;;  %v1653_v11 = vld [vmem:[#allocation7 + $0xe8] sm:$0xff]  ;;  %v1628_v12 = vld [vmem:[#allocation7 + $0x20] sm:$0xff]  ;;  %v1627_v16 = vld [vmem:[#allocation7 + $0x18] sm:$0xff] }
  0x1b   :  { %641 = vmatpush.bf16.msra.mxu0 %v1630_v4  ;;  %v1636_v13 = vld [vmem:[#allocation7 + $0x60] sm:$0xff]  ;;  %v1635_v17 = vld [vmem:[#allocation7 + $0x58] sm:$0xff]  ;;  %v1626_v20 = vld [vmem:[#allocation7 + $0x10] sm:$0xff] }
  0x1c   :  { %654 = vmatpush.bf16.msra.mxu1 %v1638_v5  ;;  %v1644_v14 = vld [vmem:[#allocation7 + $0xa0] sm:$0xff]  ;;  %v1643_v18 = vld [vmem:[#allocation7 + $0x98] sm:$0xff]  ;;  %v1634_v21 = vld [vmem:[#allocation7 + $0x50] sm:$0xff] }
  0x1d   :  { %667 = vmatpush.bf16.msra.mxu2 %v1646_v6  ;;  %v1652_v15 = vld [vmem:[#allocation7 + $0xe0] sm:$0xff]  ;;  %v1651_v19 = vld [vmem:[#allocation7 + $0xd8] sm:$0xff]  ;;  %v1642_v22 = vld [vmem:[#allocation7 + $0x90] sm:$0xff] }
  0x1e   :  { %680 = vmatpush.bf16.msra.mxu3 %v1654_v7  ;;  %v1650_v23 = vld [vmem:[#allocation7 + $0xd0] sm:$0xff]  ;;  %v1625_v24 = vld [vmem:[#allocation7 + $0x8] sm:$0xff]  ;;  %v97_v28 = vld [vmem:[#allocation2 + $0x8] sm:$0xff] }
  0x1f   :  { %642 = vmatpush.bf16.msra.mxu0 %v1629_v8  ;;  %v1633_v25 = vld [vmem:[#allocation7 + $0x48] sm:$0xff]  ;;  %v96_v29 = vld [vmem:[#allocation2] sm:$0xff]  ;;  %v1624_v30 = vld [vmem:[#allocation7] sm:$0xff]  ;;  %v234_v32 = vunpack.c.l.b16 %v97_v28  ;;  %v235_v36 = vunpack.c.h.b16 %v97_v28 }
  0x20   :  { %655 = vmatpush.bf16.msra.mxu1 %v1637_v9  ;;  %v1641_v26 = vld [vmem:[#allocation7 + $0x88] sm:$0xff]  ;;  %v1632_v31 = vld [vmem:[#allocation7 + $0x40] sm:$0xff]  ;;  %v232_v33 = vunpack.c.l.b16 %v96_v29  ;;  %v233_v37 = vunpack.c.h.b16 %v96_v29  ;;  %v1663_v38 = vld [vmem:[#allocation7 + $0x138] sm:$0xff] }
  0x21   :  { %668 = vmatpush.bf16.msra.mxu2 %v1645_v10  ;;  %v1649_v27 = vld [vmem:[#allocation7 + $0xc8] sm:$0xff]  ;;  %v1640_v34 = vld [vmem:[#allocation7 + $0x80] sm:$0xff]  ;;  %v1671_v39 = vld [vmem:[#allocation7 + $0x178] sm:$0xff]  ;;  %v242_v42 = vpack.c.b16 %v234_v32, %v234_v32  ;;  %v243_v44 = vpack.c.b16 %v235_v36, %v235_v36 }
  0x22   :  { %681 = vmatpush.bf16.msra.mxu3 %v1653_v11  ;;  %v1648_v35 = vld [vmem:[#allocation7 + $0xc0] sm:$0xff]  ;;  %v1679_v40 = vld [vmem:[#allocation7 + $0x1b8] sm:$0xff]  ;;  %v240_v43 = vpack.c.b16 %v232_v33, %v232_v33  ;;  %v241_v45 = vpack.c.b16 %v233_v37, %v233_v37  ;;  %v1662_v46 = vld [vmem:[#allocation7 + $0x130] sm:$0xff] }
  0x23   :  { %643 = vmatpush.bf16.msra.mxu0 %v1628_v12  ;;  %v1687_v41 = vld [vmem:[#allocation7 + $0x1f8] sm:$0xff]  ;;  %v1670_v47 = vld [vmem:[#allocation7 + $0x170] sm:$0xff]  ;;  %v1661_v50 = vld [vmem:[#allocation7 + $0x128] sm:$0xff] }
  0x24   :  { %656 = vmatpush.bf16.msra.mxu1 %v1636_v13  ;;  %v1678_v48 = vld [vmem:[#allocation7 + $0x1b0] sm:$0xff]  ;;  %v1669_v51 = vld [vmem:[#allocation7 + $0x168] sm:$0xff]  ;;  %v1660_v54 = vld [vmem:[#allocation7 + $0x120] sm:$0xff] }
  0x25   :  { %669 = vmatpush.bf16.msra.mxu2 %v1644_v14  ;;  %v1686_v49 = vld [vmem:[#allocation7 + $0x1f0] sm:$0xff]  ;;  %v1677_v52 = vld [vmem:[#allocation7 + $0x1a8] sm:$0xff]  ;;  %v1668_v55 = vld [vmem:[#allocation7 + $0x160] sm:$0xff] }
  0x26   :  { %682 = vmatpush.bf16.msra.mxu3 %v1652_v15  ;;  %v1685_v53 = vld [vmem:[#allocation7 + $0x1e8] sm:$0xff]  ;;  %v1676_v56 = vld [vmem:[#allocation7 + $0x1a0] sm:$0xff]  ;;  %v1659_v58 = vld [vmem:[#allocation7 + $0x118] sm:$0xff] }
  0x27   :  { %644 = vmatpush.bf16.msra.mxu0 %v1627_v16  ;;  %v1684_v57 = vld [vmem:[#allocation7 + $0x1e0] sm:$0xff]  ;;  %v1667_v59 = vld [vmem:[#allocation7 + $0x158] sm:$0xff]  ;;  %v1658_v62 = vld [vmem:[#allocation7 + $0x110] sm:$0xff] }
  0x28   :  { %657 = vmatpush.bf16.msra.mxu1 %v1635_v17  ;;  %v1675_v60 = vld [vmem:[#allocation7 + $0x198] sm:$0xff]  ;;  %v1666_v63 = vld [vmem:[#allocation7 + $0x150] sm:$0xff]  ;;  %v1657_v2 = vld [vmem:[#allocation7 + $0x108] sm:$0xff] }
  0x29   :  { %670 = vmatpush.bf16.msra.mxu2 %v1643_v18  ;;  %v1683_v61 = vld [vmem:[#allocation7 + $0x1d8] sm:$0xff]  ;;  %v1674_v0 = vld [vmem:[#allocation7 + $0x190] sm:$0xff]  ;;  %v1665_v3 = vld [vmem:[#allocation7 + $0x148] sm:$0xff] }
  0x2a   :  { %683 = vmatpush.bf16.msra.mxu3 %v1651_v19  ;;  %v1682_v1 = vld [vmem:[#allocation7 + $0x1d0] sm:$0xff]  ;;  %v98_v4 = vld [vmem:[#allocation2 + $0x10] sm:$0xff]  ;;  %v1656_v10 = vld [vmem:[#allocation7 + $0x100] sm:$0xff] }
  0x2b   :  { %645 = vmatpush.bf16.msra.mxu0 %v1626_v20  ;;  %v1673_v5 = vld [vmem:[#allocation7 + $0x188] sm:$0xff]  ;;  %v99_v7 = vld [vmem:[#allocation2 + $0x18] sm:$0xff]  ;;  %v236_v8 = vunpack.c.l.b16 %v98_v4  ;;  %v237_v9 = vunpack.c.h.b16 %v98_v4  ;;  %v1664_v11 = vld [vmem:[#allocation7 + $0x140] sm:$0xff] }
  0x2c   :  { %658 = vmatpush.bf16.msra.mxu1 %v1634_v21  ;;  %v1681_v6 = vld [vmem:[#allocation7 + $0x1c8] sm:$0xff]  ;;  %v238_v12 = vunpack.c.l.b16 %v99_v7  ;;  %v239_v13 = vunpack.c.h.b16 %v99_v7  ;;  %v1672_v14 = vld [vmem:[#allocation7 + $0x180] sm:$0xff]  ;;  %v1706_v28 = vld [vmem:[#allocation10 + $0x74] sm:$0xf] }
  0x2d   :  { %671 = vmatpush.bf16.msra.mxu2 %v1642_v22  ;;  %v1680_v15 = vld [vmem:[#allocation7 + $0x1c0] sm:$0xff]  ;;  %v244_v16 = vpack.c.b16 %v236_v8, %v236_v8  ;;  %v245_v17 = vpack.c.b16 %v237_v9, %v237_v9  ;;  %v1705_v32 = vld [vmem:[#allocation10 + $0x64] sm:$0xf0]  ;;  %v1601_v36 = vld [vmem:[#allocation10 + $0x68] sm:$0xf0] }
  0x2e   :  { %684 = vmatpush.bf16.msra.mxu3 %v1650_v23  ;;  %v246_v18 = vpack.c.b16 %v238_v12, %v238_v12  ;;  %v247_v19 = vpack.c.b16 %v239_v13, %v239_v13  ;;  %v1575_v4 = vld [vmem:[#allocation10 + $0x30] sm:$0xf]  ;;  %v1577_v8 = vld [vmem:[#allocation10 + $0x38] sm:$0xf0]  ;;  %v1696_v12 = vld [vmem:[#allocation10 + $0x24] sm:$0xf] }
  0x2f   :  { %646 = vmatpush.bf16.msra.mxu0 %v1625_v24 }
  0x30   :  { %659 = vmatpush.bf16.msra.mxu1 %v1633_v25 }
  0x31   :  { %672 = vmatpush.bf16.msra.mxu2 %v1641_v26  ;;  %v1607_v26 = vld [vmem:[#allocation10 + $0x70] sm:$0xf] }
  0x32   :  { %685 = vmatpush.bf16.msra.mxu3 %v1649_v27  ;;  %v1707_v27 = vld [vmem:[#allocation10 + $0x74] sm:$0xf0] }
  0x33   :  { %647 = vmatpush.bf16.msra.mxu0 %v1624_v30  ;;  %v1608_v29 = vor.u32 %v1707_v27, %v1607_v26  ;;  %v1609_v30 = vld [vmem:[#allocation10 + $0x78] sm:$0xf0]  ;;  %v1553_v26 = vld [vmem:[#allocation10 + $0x8] sm:$0xf0] }
  0x34   :  { %660 = vmatpush.bf16.msra.mxu1 %v1632_v31  ;;  %v1599_v31 = vld [vmem:[#allocation10 + $0x60] sm:$0xf] }
  0x35   :  { %673 = vmatpush.bf16.msra.mxu2 %v1640_v34  ;;  %v1612_v34 = vor.u32 %v1706_v28, %v1609_v30  ;;  %v744_v28 = vld [vmem:[#allocation5] sm:$0xff]  ;;  %v1902_v30 = vmov 0  }
  0x36   :  { %686 = vmatpush.bf16.msra.mxu3 %v1648_v35  ;;  %648 = vmatmul.bf16.vlgmr.msra.gmra.mxu0 %v240_v43  ;;  %v1704_v35 = vld [vmem:[#allocation10 + $0x64] sm:$0xf] }
  0x37   :  { %692 = vmatpush.bf16.msrb.mxu0 %v1663_v38  ;;  %661 = vmatmul.bf16.vlgmr.msra.gmra.mxu1 %v241_v45  ;;  %v1600_v38 = vor.u32 %v1705_v32, %v1599_v31  ;;  %v1903_v31 = vmov 2  }
  0x38   :  { %705 = vmatpush.bf16.msrb.mxu1 %v1671_v39  ;;  %674 = vmatmul.bf16.vlgmr.msra.gmra.mxu2 %v242_v42  ;;  %v1604_v39 = vor.u32 %v1704_v35, %v1601_v36  ;;  %v1905_v35 = vmov 3  }
  0x39   :  { %718 = vmatpush.bf16.msrb.mxu2 %v1679_v40  ;;  %687 = vmatmul.bf16.vlgmr.msra.gmra.mxu3 %v243_v44 }
  0x3a   :  { %731 = vmatpush.bf16.msrb.mxu3 %v1687_v41  ;;  %1727 = vset.pattern.permute.xlu0 %v1902_v30 }
  0x3b   :  { %693 = vmatpush.bf16.msrb.mxu0 %v1662_v46  ;;  %1729 = vset.pattern.permute.xlu2 %v1903_v31 }
  0x3c   :  { %706 = vmatpush.bf16.msrb.mxu1 %v1670_v47  ;;  %769 = vperm.xlu2 %1729, %v744_v28  }
  0x3d   :  { %719 = vmatpush.bf16.msrb.mxu2 %v1678_v48 }
  0x3e   :  { %732 = vmatpush.bf16.msrb.mxu3 %v1686_v49 }
  0x3f   :  { %694 = vmatpush.bf16.msrb.mxu0 %v1661_v50 }
  0x40   :  { %707 = vmatpush.bf16.msrb.mxu1 %v1669_v51 }
  0x41   :  { %720 = vmatpush.bf16.msrb.mxu2 %v1677_v52 }
  0x42   :  { %733 = vmatpush.bf16.msrb.mxu3 %v1685_v53 }
  0x43   :  { %695 = vmatpush.bf16.msrb.mxu0 %v1660_v54 }
  0x44   :  { %708 = vmatpush.bf16.msrb.mxu1 %v1668_v55  ;;  %1730 = vset.pattern.permute.xlu2 %v1905_v35 }
  0x45   :  { %721 = vmatpush.bf16.msrb.mxu2 %v1676_v56  ;;  %v1591_v56 = vld [vmem:[#allocation10 + $0x50] sm:$0xf]  ;;  %780 = vperm.xlu2 %1730, %v744_v28  }
  0x46   :  { %734 = vmatpush.bf16.msrb.mxu3 %v1684_v57  ;;  %v1703_v57 = vld [vmem:[#allocation10 + $0x54] sm:$0xf0] }
  0x47   :  { %696 = vmatpush.bf16.msrb.mxu0 %v1659_v58  ;;  %v1702_v58 = vld [vmem:[#allocation10 + $0x54] sm:$0xf] }
  0x48   :  { %709 = vmatpush.bf16.msrb.mxu1 %v1667_v59  ;;  %v1592_v59 = vor.u32 %v1703_v57, %v1591_v56 }
  0x49   :  { %722 = vmatpush.bf16.msrb.mxu2 %v1675_v60  ;;  %v1593_v60 = vld [vmem:[#allocation10 + $0x58] sm:$0xf0] }
  0x4a   :  { %735 = vmatpush.bf16.msrb.mxu3 %v1683_v61  ;;  %v1596_v61 = vor.u32 %v1702_v58, %v1593_v60 }
  0x4b   :  { %697 = vmatpush.bf16.msrb.mxu0 %v1658_v62  ;;  %v1583_v62 = vld [vmem:[#allocation10 + $0x40] sm:$0xf] }
  0x4c   :  { %710 = vmatpush.bf16.msrb.mxu1 %v1666_v63  ;;  %v1701_v63 = vld [vmem:[#allocation10 + $0x44] sm:$0xf0] }
  0x4d   :  { %723 = vmatpush.bf16.msrb.mxu2 %v1674_v0  ;;  %v1700_v0 = vld [vmem:[#allocation10 + $0x44] sm:$0xf] }
  0x4e   :  { %736 = vmatpush.bf16.msrb.mxu3 %v1682_v1  ;;  %v1584_v1 = vor.u32 %v1701_v63, %v1583_v62 }
  0x4f   :  { %698 = vmatpush.bf16.msrb.mxu0 %v1657_v2  ;;  %v1585_v2 = vld [vmem:[#allocation10 + $0x48] sm:$0xf0] }
  0x50   :  { %711 = vmatpush.bf16.msrb.mxu1 %v1665_v3  ;;  %v1588_v3 = vor.u32 %v1700_v0, %v1585_v2 }
  0x51   :  { %724 = vmatpush.bf16.msrb.mxu2 %v1673_v5  ;;  %v1699_v5 = vld [vmem:[#allocation10 + $0x34] sm:$0xf0] }
  0x52   :  { %737 = vmatpush.bf16.msrb.mxu3 %v1681_v6  ;;  %v1698_v6 = vld [vmem:[#allocation10 + $0x34] sm:$0xf]  ;;  %v1576_v7 = vor.u32 %v1699_v5, %v1575_v4 }
  0x53   :  { %699 = vmatpush.bf16.msrb.mxu0 %v1656_v10  ;;  %v1580_v9 = vor.u32 %v1698_v6, %v1577_v8  ;;  %v1567_v10 = vld [vmem:[#allocation10 + $0x20] sm:$0xf]  ;;  %v1691_v8 = vld [vmem:[#allocation8 + $0x18] sm:$0xff] }
  0x54   :  { %712 = vmatpush.bf16.msrb.mxu1 %v1664_v11  ;;  %v1697_v11 = vld [vmem:[#allocation10 + $0x24] sm:$0xf0] }
  0x55   :  { %725 = vmatpush.bf16.msrb.mxu2 %v1672_v14  ;;  %v1568_v13 = vor.u32 %v1697_v11, %v1567_v10  ;;  %v1569_v14 = vld [vmem:[#allocation10 + $0x28] sm:$0xf0] }
  0x56   :  { %738 = vmatpush.bf16.msrb.mxu3 %v1680_v15  ;;  %700 = vmatmul.bf16.vlgmr.msrb.gmra.mxu0 %v244_v16  ;;  %v1572_v15 = vor.u32 %v1696_v12, %v1569_v14  ;;  %v1559_v16 = vld [vmem:[#allocation10 + $0x10] sm:$0xf] }
  0x57   :  { %713 = vmatmul.bf16.vlgmr.msrb.gmra.mxu1 %v245_v17  ;;  %v1695_v17 = vld [vmem:[#allocation10 + $0x14] sm:$0xf0]  ;;  %874 = vmatpush.bf16.msra.mxu0 %v1691_v8 }
  0x58   :  { %726 = vmatmul.bf16.vlgmr.msrb.gmra.mxu2 %v246_v18  ;;  %1014 = vmatpush.bf16.msra.mxu1 %v1608_v29  ;;  %v1694_v18 = vld [vmem:[#allocation10 + $0x14] sm:$0xf]  ;;  %v1901_v29 = vmov 1  }
  0x59   :  { %739 = vmatmul.bf16.vlgmr.msrb.gmra.mxu3 %v247_v19  ;;  %1027 = vmatpush.bf16.msra.mxu2 %v1612_v34  ;;  %v1560_v19 = vor.u32 %v1695_v17, %v1559_v16  ;;  %v1904_v34 = vmov 4   ;;  %v1689_v16 = vld [vmem:[#allocation8 + $0x8] sm:$0xff] }
  0x5a   :  { %1728 = vset.pattern.permute.xlu1 %v1901_v29 }
  0x5b   :  { %758 = vperm.xlu1 %1728, %v744_v28  }
  0x5c   :  { %1015 = vmatpush.bf16.msra.mxu1 %v1600_v38 }
  0x5d   :  { %1028 = vmatpush.bf16.msra.mxu2 %v1604_v39 }
  0x60   :  { %1016 = vmatpush.bf16.msra.mxu1 %v1592_v59 }
  0x61   :  { %1029 = vmatpush.bf16.msra.mxu2 %v1596_v61  ;;  %v1909_v61 = vmov 0.0  }
  0x64   :  { %1017 = vmatpush.bf16.msra.mxu1 %v1584_v1 }
  0x65   :  { %1030 = vmatpush.bf16.msra.mxu2 %v1588_v3 }
  0x68   :  { %1018 = vmatpush.bf16.msra.mxu1 %v1576_v7 }
  0x69   :  { %1031 = vmatpush.bf16.msra.mxu2 %v1580_v9 }
  0x6c   :  { %1019 = vmatpush.bf16.msra.mxu1 %v1568_v13  ;;  %v1690_v13 = vld [vmem:[#allocation8 + $0x10] sm:$0xff] }
  0x6d   :  { %1032 = vmatpush.bf16.msra.mxu2 %v1572_v15  ;;  %875 = vmatpush.bf16.msra.mxu0 %v1690_v13 }
  0x70   :  { %1020 = vmatpush.bf16.msra.mxu1 %v1560_v19 }
  0x71   :  { %876 = vmatpush.bf16.msra.mxu0 %v1689_v16 }
  0x96   :  { %v770_v2 = vpop.permute.xlu2 %769 }
  0x9f   :  { %v781_v6 = vpop.permute.xlu2 %780 }
  0xb3   :  { %v649_v20 = vpop.f32.mrf.mxu0 }
  0xb4   :  { %v662_v21 = vpop.f32.mrf.mxu1 }
  0xb5   :  { %v663_v40 = vadd.f32 %v662_v21, %v649_v20  ;;  %v1561_v20 = vld [vmem:[#allocation10 + $0x18] sm:$0xf0] }
  0xb6   :  { %v1564_v21 = vor.u32 %v1694_v18, %v1561_v20 }
  0xb8   :  { %1033 = vmatpush.bf16.msra.mxu2 %v1564_v21  ;;  %v1688_v21 = vld [vmem:[#allocation8] sm:$0xff] }
  0xb9   :  { %877 = vmatpush.bf16.msra.mxu0 %v1688_v21 }
  0xbb   :  { %v675_v22 = vpop.f32.mrf.mxu2  ;;  %v651_v24 = vpop.f32.mrf.mxu0 }
  0xbc   :  { %v688_v23 = vpop.f32.mrf.mxu3  ;;  %v664_v25 = vpop.f32.mrf.mxu1  ;;  %v676_v41 = vadd.f32 %v675_v22, %v663_v40  ;;  %v1551_v22 = vld [vmem:[#allocation10] sm:$0xf]  ;;  %v1692_v24 = vld [vmem:[#allocation10 + $0x4] sm:$0xf]  ;;  %v1906_v40 = vmov 5  }
  0xbd   :  { %v1556_v27 = vor.u32 %v1692_v24, %v1553_v26  ;;  %1732 = vset.pattern.permute.xlu2 %v1906_v40 }
  0xbe   :  { %v689_v42 = vadd.f32 %v688_v23, %v676_v41  ;;  %v1693_v23 = vld [vmem:[#allocation10 + $0x4] sm:$0xf0]  ;;  %802 = vperm.xlu2 %1732, %v744_v28  }
  0xbf   :  { %v1552_v25 = vor.u32 %v1693_v23, %v1551_v22  ;;  %1034 = vmatpush.bf16.msra.mxu2 %v1556_v27 }
  0xc1   :  { %1021 = vmatpush.bf16.msra.mxu1 %v1552_v25 }
  0xc3   :  { %v677_v33 = vpop.f32.mrf.mxu2 }
  0xc4   :  { %v690_v37 = vpop.f32.mrf.mxu3 }
  0xcd   :  { %v759_v59 = vpop.permute.xlu1 %758 }
  0xd3   :  { %v701_v43 = vpop.f32.mrf.mxu0 }
  0xd4   :  { %v714_v44 = vpop.f32.mrf.mxu1  ;;  %v702_v45 = vadd.f32 %v701_v43, %v689_v42 }
  0xd6   :  { %v715_v46 = vadd.f32 %v714_v44, %v702_v45 }
  0xdb   :  { %v727_v47 = vpop.f32.mrf.mxu2  ;;  %v703_v50 = vpop.f32.mrf.mxu0 }
  0xdc   :  { %v740_v48 = vpop.f32.mrf.mxu3  ;;  %v728_v49 = vadd.f32 %v727_v47, %v715_v46  ;;  %v716_v51 = vpop.f32.mrf.mxu1  ;;  %v1907_v46 = vmov 6   ;;  %v745_v47 = vlaneseq }
  0xdd   :  { %1733 = vset.pattern.permute.xlu1 %v1907_v46 }
  0xde   :  { %v1956_v52 = vadd.f32 %v740_v48, %v728_v49  ;;  %v1964_v48 = vand.u32 127, %v745_v47  ;;  %v1908_v49 = vmov 7  }
  0xdf   :  { %1734 = vset.pattern.permute.xlu2 %v1908_v49 }
  0xe0   :  { %v883_v53 = vmul.f32 %v1956_v52, %v1956_v52  ;;  %vm1112_vm3 = vcmp.ge.s32.totalorder %v1964_v48, 64  ;;  %vm1114_vm4 = vcmp.lt.s32.totalorder %v1964_v48, 72  ;;  %vm1048_vm6 = vcmp.lt.s32.totalorder %v1964_v48, 35 }
  0xe1   :  { %vm1116_vm5 = vmand %vm1112_vm3, %vm1114_vm4  ;;  %vm760_vm8 = vcmp.eq.s32.totalorder %v1964_v48, %v759_v59  ;;  %vm771_vm10 = vcmp.eq.s32.totalorder %v1964_v48, %v770_v2  ;;  %vm782_vm11 = vcmp.eq.s32.totalorder %v1964_v48, %v781_v6 }
  0xe2   :  { %884 = vadd.xlane.f32.xlu0 %v883_v53  ;;  %v1525_v62 = vsel %vm760_vm8, 1.0, %v1909_v61  ;;  %v1526_v4 = vsel %vm771_vm10, 1.0, %v1909_v61  ;;  %v1527_v10 = vsel %vm782_vm11, 1.0, %v1909_v61 }
  0xe3   :  { %v729_v54 = vpop.f32.mrf.mxu2 }
  0xe4   :  { %v742_v55 = vpop.f32.mrf.mxu3  ;;  %v1976_v54 = vadd.s32 128, %v1964_v48 }
  0xe6   :  { %vm1183_vm7 = vcmp.lt.s32.totalorder %v1976_v54, 161 }
  0xf6   :  { %748 = vperm.xlu0 %1727, %v744_v28  }
  0xfe   :  { %1731 = vset.pattern.permute.xlu0 %v1904_v34 }
  0xff   :  { %791 = vperm.xlu0 %1731, %v744_v28  }
 0x107   :  { %1735 = vset.pattern.permute.xlu0 %v1908_v49 }
 0x118   :  { %v803_v12 = vpop.permute.xlu2 %802 }
 0x155   :  { %v885_v32 = vpop.xlane.xlu0 %884 }
 0x156   :  { %v892_v33 = vmax.f32 %v885_v32, 1e-12 }
 0x158   :  { %1736 = vrsqrt.f32 %v892_v33  ;;  %vm899_vm1 = vweird.f32 %v892_v33 }
 0x15e   :  { %v1737_v36 = vpop.eup %1736 }
 0x15f   :  { %v894_v37 = vmul.f32 %v1737_v36, %v892_v33  ;;  %vm900_vm0 = vweird.f32 %v1737_v36 }
 0x160   :  { %vm901_vm2 = vmor %vm899_vm1, %vm900_vm0 }
 0x161   :  { %v895_v38 = vmul.f32 %v1737_v36, %v894_v37 }
 0x163   :  { %v896_v39 = vmul.f32 0.5, %v895_v38 }
 0x165   :  { %v897_v41 = vsub.f32 1.5, %v896_v39 }
 0x167   :  { %v898_v42 = vmul.f32 %v1737_v36, %v897_v41 }
 0x168   :  { %v749_v60 = vpop.permute.xlu0 %748 }
 0x169   :  { %v1960_v43 = vsel %vm901_vm2, %v1737_v36, %v898_v42  ;;  %vm750_vm9 = vcmp.eq.s32.totalorder %v1964_v48, %v749_v60 }
 0x16a   :  { %v916_v44 = vmul.f32 %v1960_v43, %v1956_v52  ;;  %v1524_v63 = vsel %vm750_vm9, 1.0, %v1909_v61  ;;  %vm866_vm9 = vcmask 523264  }
 0x16b   :  { %v766_v0 = vadd.f32 %v1525_v62, %v1524_v63 }
 0x16c   :  { %v917_v45 = vpack.c.bf16 %v916_v44, %v916_v44 }
 0x16d   :  { %v767_v1 = vpack.c.bf16 %v766_v0, %v766_v0 }
 0x16e   :  { %1022 = vmatmul.bf16.vlgmr.msra.gmra.mxu1 %v917_v45  ;;  %1035 = vmatmul.bf16.vlgmr.msra.gmra.mxu2 %v917_v45 }
 0x16f   :  { %v775_v3 = vunpack.c.l.bf16 %v767_v1 }
 0x171   :  { %v777_v5 = vadd.f32 %v1526_v4, %v775_v3  ;;  %v792_v14 = vpop.permute.xlu0 %791 }
 0x172   :  { %vm793_vm12 = vcmp.eq.s32.totalorder %v1964_v48, %v792_v14 }
 0x173   :  { %v778_v7 = vpack.c.bf16 %v777_v5, %v777_v5  ;;  %v1528_v18 = vsel %vm793_vm12, 1.0, %v1909_v61 }
 0x175   :  { %v786_v9 = vunpack.c.l.bf16 %v778_v7 }
 0x177   :  { %v788_v11 = vadd.f32 %v1527_v10, %v786_v9 }
 0x179   :  { %v789_v15 = vpack.c.bf16 %v788_v11, %v788_v11 }
 0x17b   :  { %v797_v17 = vunpack.c.l.bf16 %v789_v15 }
 0x17d   :  { %v799_v27 = vadd.f32 %v1528_v18, %v797_v17 }
 0x17f   :  { %v800_v34 = vpack.c.bf16 %v799_v27, %v799_v27 }
 0x181   :  { %v808_v38 = vunpack.c.l.bf16 %v800_v34 }
 0x1eb   :  { %v1023_v50 = vpop.f32.mrf.mxu1 }
 0x1ec   :  { %v1969_v51 = vsel %vm1116_vm5, %v1023_v50, -inf  ;;  %v1971_v53 = vsel %vm1048_vm6, %v1023_v50, -inf  ;;  %vm804_vm5 = vcmp.eq.s32.totalorder %v1964_v48, %v803_v12 }
 0x1ed   :  { %1121 = vmax.xlane.f32.xlu2 %v1969_v51  ;;  %1055 = vmax.xlane.f32.xlu1 %v1971_v53  ;;  %v1529_v40 = vsel %vm804_vm5, 1.0, %v1909_v61 }
 0x1ee   :  { %v810_v42 = vadd.f32 %v1529_v40, %v808_v38 }
 0x1f0   :  { %v811_v44 = vpack.c.bf16 %v810_v42, %v810_v42 }
 0x1f1   :  { %v1036_v55 = vpop.f32.mrf.mxu2 }
 0x1f2   :  { %v1979_v57 = vsel %vm1183_vm7, %v1036_v55, -inf  ;;  %v819_v47 = vunpack.c.l.bf16 %v811_v44 }
 0x1f3   :  { %v1025_v56 = vpop.f32.mrf.mxu1 }
 0x1f5   :  { %1189 = vmax.xlane.f32.xlu2 %v1979_v57 }
 0x1f9   :  { %v1038_v58 = vpop.f32.mrf.mxu2 }
 0x206   :  { %813 = vperm.xlu1 %1733, %v744_v28  }
 0x20d   :  { %824 = vperm.xlu2 %1734, %v744_v28  }
 0x260   :  { %v1122_v19 = vpop.xlane.xlu2 %1121  ;;  %v1056_v20 = vpop.xlane.xlu1 %1055 }
 0x261   :  { %vm1123_vm13 = vcmp.eq.f32.partialorder %v1969_v51, %v1122_v19  ;;  %vm1616_vm14 = vcmp.eq.f32.partialorder %v1122_v19, -inf  ;;  %vm1057_vm15 = vcmp.eq.f32.partialorder %v1971_v53, %v1056_v20  ;;  %vm1614_vm0 = vcmp.eq.f32.partialorder %v1056_v20, -inf }
 0x262   :  { %v1125_v22 = vsel %vm1123_vm13, %v1964_v48, 1000000000  ;;  %v1126_v23 = vsel %vm1616_vm14, %v1976_v54, 1000000000  ;;  %v1059_v24 = vsel %vm1057_vm15, %v1964_v48, 1000000000 }
 0x263   :  { %vm1127_vm1 = vcmp.lt.s32.totalorder %v1125_v22, %v1126_v23  ;;  %v1060_v25 = vsel %vm1614_vm0, %v1976_v54, 1000000000 }
 0x264   :  { %vm1061_vm2 = vcmp.lt.s32.totalorder %v1059_v24, %v1060_v25  ;;  %v1128_v26 = vsel %vm1127_vm1, %v1125_v22, %v1126_v23 }
 0x265   :  { %v1130_v28 = vshra.s32 %v1128_v26, 16  ;;  %v1062_v29 = vsel %vm1061_vm2, %v1059_v24, %v1060_v25  ;;  %v1129_v62 = vand.u32 65535, %v1128_v26 }
 0x266   :  { %v1064_v30 = vshra.s32 %v1062_v29, 16  ;;  %v1063_v63 = vand.u32 65535, %v1062_v29 }
 0x267   :  { %v1132_v31 = vcvt.s32.f32 %v1130_v28  ;;  %v1131_v1 = vcvt.s32.f32 %v1129_v62 }
 0x268   :  { %v1190_v32 = vpop.xlane.xlu2 %1189  ;;  %v1066_v33 = vcvt.s32.f32 %v1064_v30  ;;  %v1065_v3 = vcvt.s32.f32 %v1063_v63 }
 0x269   :  { %vm1620_vm3 = vcmp.eq.f32.partialorder %v1190_v32, -inf  ;;  %vm1192_vm4 = vcmp.eq.f32.partialorder %v1979_v57, %v1190_v32  ;;  %1133 = vmin.xlane.f32.xlu2 %v1132_v31 }
 0x26a   :  { %v1193_v35 = vsel %vm1620_vm3, %v1964_v48, 1000000000  ;;  %v1194_v36 = vsel %vm1192_vm4, %v1976_v54, 1000000000  ;;  %1067 = vmin.xlane.f32.xlu0 %v1066_v33 }
 0x26b   :  { %vm1195_vm6 = vcmp.lt.s32.totalorder %v1193_v35, %v1194_v36 }
 0x26c   :  { %v1196_v37 = vsel %vm1195_vm6, %v1193_v35, %v1194_v36 }
 0x26d   :  { %v1198_v39 = vshra.s32 %v1196_v37, 16  ;;  %v1197_v6 = vand.u32 65535, %v1196_v37 }
 0x26f   :  { %v1200_v41 = vcvt.s32.f32 %v1198_v39  ;;  %v1199_v8 = vcvt.s32.f32 %v1197_v6 }
 0x270   :  { %v825_v46 = vpop.permute.xlu2 %824 }
 0x271   :  { %1201 = vmin.xlane.f32.xlu1 %v1200_v41  ;;  %vm826_vm8 = vcmp.eq.s32.totalorder %v1964_v48, %v825_v46 }
 0x272   :  { %v1531_v56 = vsel %vm826_vm8, 1.0, %v1909_v61 }
 0x278   :  { %v814_v45 = vpop.permute.xlu1 %813 }
 0x279   :  { %vm815_vm7 = vcmp.eq.s32.totalorder %v1964_v48, %v814_v45 }
 0x27a   :  { %v1530_v49 = vsel %vm815_vm7, 1.0, %v1909_v61 }
 0x27b   :  { %v821_v50 = vadd.f32 %v1530_v49, %v819_v47 }
 0x27d   :  { %v822_v55 = vpack.c.bf16 %v821_v50, %v821_v50 }
 0x27f   :  { %v830_v58 = vunpack.c.l.bf16 %v822_v55 }
 0x281   :  { %v832_v59 = vadd.f32 %v1531_v56, %v830_v58 }
 0x283   :  { %v833_v60 = vpack.c.bf16 %v832_v59, %v832_v59 }
 0x285   :  { %1548 = vmatmul.msk.bf16.vlgmr.msra.gmra.mxu0 %vm866_vm9, %v833_v60 }
 0x2dc   :  { %v1134_v0 = vpop.xlane.xlu2 %1133 }
 0x2dd   :  { %v1068_v2 = vpop.xlane.xlu0 %1067  ;;  %vm1135_vm10 = vcmp.eq.f32.partialorder %v1132_v31, %v1134_v0  ;;  %v1140_v12 = vcvt.f32.s32 %v1134_v0 }
 0x2de   :  { %v1136_v4 = vsel %vm1135_vm10, %v1131_v1, inf  ;;  %vm1069_vm11 = vcmp.eq.f32.partialorder %v1066_v33, %v1068_v2  ;;  %v1074_v13 = vcvt.f32.s32 %v1068_v2 }
 0x2df   :  { %1137 = vmin.xlane.f32.xlu0 %v1136_v4  ;;  %v1070_v5 = vsel %vm1069_vm11, %v1065_v3, inf  ;;  %v1141_v15 = vshll.u32 %v1140_v12, 16 }
 0x2e0   :  { %1071 = vmin.xlane.f32.xlu2 %v1070_v5  ;;  %v1075_v18 = vshll.u32 %v1074_v13, 16 }
 0x2e4   :  { %v1202_v7 = vpop.xlane.xlu1 %1201 }
 0x2e5   :  { %vm1203_vm12 = vcmp.eq.f32.partialorder %v1200_v41, %v1202_v7  ;;  %v1208_v22 = vcvt.f32.s32 %v1202_v7 }
 0x2e6   :  { %v1204_v9 = vsel %vm1203_vm12, %v1199_v8, inf }
 0x2e7   :  { %v1209_v26 = vshll.u32 %v1208_v22, 16 }
 0x2e8   :  { %1205 = vmin.xlane.f32.xlu2 %v1204_v9 }
 0x302   :  { %v879_v10 = vpop.f32.mrf.mxu0 }
 0x303   :  { %v889_v45 = vmul.f32 %v879_v10, %v1956_v52  ;;  %v886_v47 = vmul.f32 %v879_v10, %v879_v10 }
 0x30a   :  { %v881_v11 = vpop.f32.mrf.mxu0 }
 0x352   :  { %v1138_v14 = vpop.xlane.xlu0 %1137 }
 0x353   :  { %v1072_v16 = vpop.xlane.xlu2 %1071  ;;  %v1139_v17 = vcvt.f32.s32 %v1138_v14 }
 0x354   :  { %v1073_v19 = vcvt.f32.s32 %v1072_v16 }
 0x355   :  { %v2007_v20 = vadd.s32 %v1141_v15, %v1139_v17 }
 0x356   :  { %v2009_v21 = vadd.s32 %v1075_v18, %v1073_v19 }
 0x357   :  { %vm1143_vm13 = vcmp.eq.s32.totalorder %v1964_v48, %v2007_v20 }
 0x358   :  { %vm1077_vm14 = vcmp.eq.s32.totalorder %v1964_v48, %v2009_v21  ;;  %v1145_v23 = vsel %vm1143_vm13, -inf, %v1969_v51 }
 0x359   :  { %v1079_v24 = vsel %vm1077_vm14, -inf, %v1971_v53  ;;  %1148 = vmax.xlane.f32.xlu1 %v1145_v23 }
 0x35a   :  { %1082 = vmax.xlane.f32.xlu0 %v1079_v24 }
 0x35b   :  { %v1206_v25 = vpop.xlane.xlu2 %1205 }
 0x35c   :  { %v1207_v27 = vcvt.f32.s32 %v1206_v25  ;;  %v1618_v25 = vadd.s32 4294967232, %v2007_v20 }
 0x35e   :  { %v2017_v28 = vadd.s32 %v1209_v26, %v1207_v27 }
 0x360   :  { %vm1212_vm15 = vcmp.eq.s32.totalorder %v1976_v54, %v2017_v28  ;;  %v1622_v27 = vadd.s32 4294967168, %v2017_v28 }
 0x361   :  { %v1214_v29 = vsel %vm1212_vm15, -inf, %v1979_v57 }
 0x362   :  { %1216 = vmax.xlane.f32.xlu2 %v1214_v29 }
 0x3cc   :  { %v1149_v30 = vpop.xlane.xlu1 %1148 }
 0x3cd   :  { %vm1150_vm0 = vcmp.eq.f32.partialorder %v1145_v23, %v1149_v30  ;;  %vm1617_vm1 = vcmp.eq.f32.partialorder %v1149_v30, -inf  ;;  %v1083_v31 = vpop.xlane.xlu0 %1082 }
 0x3ce   :  { %v1152_v51 = vsel %vm1150_vm0, %v1964_v48, 1000000000  ;;  %v1153_v53 = vsel %vm1617_vm1, %v1976_v54, 1000000000  ;;  %vm1084_vm2 = vcmp.eq.f32.partialorder %v1079_v24, %v1083_v31  ;;  %vm1615_vm3 = vcmp.eq.f32.partialorder %v1083_v31, -inf }
 0x3cf   :  { %vm1154_vm4 = vcmp.lt.s32.totalorder %v1152_v51, %v1153_v53  ;;  %v1086_v32 = vsel %vm1084_vm2, %v1964_v48, 1000000000  ;;  %v1087_v33 = vsel %vm1615_vm3, %v1976_v54, 1000000000  ;;  %v1104_v24 = vcvt.s32.f32 %v2009_v21 }
 0x3d0   :  { %vm1088_vm5 = vcmp.lt.s32.totalorder %v1086_v32, %v1087_v33  ;;  %v1155_v34 = vsel %vm1154_vm4, %v1152_v51, %v1153_v53  ;;  %vm1044_vm0 = vcmp.eq.s32.totalorder %v1964_v48, 0  ;;  %vm1108_vm1 = vcmp.eq.s32.totalorder %v1964_v48, 1 }
 0x3d1   :  { %v1157_v35 = vshra.s32 %v1155_v34, 16  ;;  %v1089_v57 = vsel %vm1088_vm5, %v1086_v32, %v1087_v33  ;;  %v1156_v49 = vand.u32 65535, %v1155_v34  ;;  %v1171_v53 = vcvt.s32.f32 %v1618_v25 }
 0x3d2   :  { %v1091_v36 = vshra.s32 %v1089_v57, 16  ;;  %v1090_v50 = vand.u32 65535, %v1089_v57  ;;  %vm1110_vm2 = vcmp.eq.s32.totalorder %v1964_v48, 2  ;;  %vm1176_vm3 = vcmp.eq.s32.totalorder %v1964_v48, 3 }
 0x3d3   :  { %v1159_v37 = vcvt.s32.f32 %v1157_v35  ;;  %v1158_v56 = vcvt.s32.f32 %v1156_v49  ;;  %vm1178_vm4 = vcmp.eq.s32.totalorder %v1964_v48, 4  ;;  %vm1244_vm5 = vcmp.eq.s32.totalorder %v1964_v48, 5 }
 0x3d4   :  { %v1093_v38 = vcvt.s32.f32 %v1091_v36  ;;  %v1092_v59 = vcvt.s32.f32 %v1090_v50 }
 0x3d5   :  { %v1217_v39 = vpop.xlane.xlu2 %1216  ;;  %1160 = vmin.xlane.f32.xlu1 %v1159_v37 }
 0x3d6   :  { %vm1621_vm6 = vcmp.eq.f32.partialorder %v1217_v39, -inf  ;;  %vm1219_vm7 = vcmp.eq.f32.partialorder %v1214_v29, %v1217_v39  ;;  %1094 = vmin.xlane.f32.xlu0 %v1093_v38 }
 0x3d7   :  { %v1220_v40 = vsel %vm1621_vm6, %v1964_v48, 1000000000  ;;  %v1221_v41 = vsel %vm1219_vm7, %v1976_v54, 1000000000  ;;  %vm1246_vm6 = vcmp.eq.s32.totalorder %v1964_v48, 6 }
 0x3d8   :  { %vm1222_vm8 = vcmp.lt.s32.totalorder %v1220_v40, %v1221_v41 }
 0x3d9   :  { %v1223_v42 = vsel %vm1222_vm8, %v1220_v40, %v1221_v41 }
 0x3da   :  { %v1225_v44 = vshra.s32 %v1223_v42, 16  ;;  %v1224_v62 = vand.u32 65535, %v1223_v42 }
 0x3dc   :  { %v1227_v46 = vcvt.s32.f32 %v1225_v44  ;;  %v1226_v52 = vcvt.s32.f32 %v1224_v62 }
 0x3dd   :  { %890 = vadd.xlane.f32.xlu1 %v889_v45 }
 0x3de   :  { %1228 = vmin.xlane.f32.xlu2 %v1227_v46  ;;  %887 = vadd.xlane.f32.xlu0 %v886_v47 }
 0x448   :  { %v1161_v55 = vpop.xlane.xlu1 %1160 }
 0x449   :  { %v1095_v58 = vpop.xlane.xlu0 %1094  ;;  %vm1162_vm9 = vcmp.eq.f32.partialorder %v1159_v37, %v1161_v55  ;;  %v1167_v13 = vcvt.f32.s32 %v1161_v55 }
 0x44a   :  { %v1163_v60 = vsel %vm1162_vm9, %v1158_v56, inf  ;;  %vm1096_vm10 = vcmp.eq.f32.partialorder %v1093_v38, %v1095_v58  ;;  %v1101_v14 = vcvt.f32.s32 %v1095_v58 }
 0x44b   :  { %1164 = vmin.xlane.f32.xlu0 %v1163_v60  ;;  %v1097_v54 = vsel %vm1096_vm10, %v1092_v59, inf  ;;  %v1168_v16 = vshll.u32 %v1167_v13, 16 }
 0x44c   :  { %1098 = vmin.xlane.f32.xlu2 %v1097_v54  ;;  %v1102_v19 = vshll.u32 %v1101_v14, 16 }
 0x450   :  { %v891_v9 = vpop.xlane.xlu1 %890 }
 0x451   :  { %v1229_v63 = vpop.xlane.xlu2 %1228  ;;  %v888_v1 = vpop.xlane.xlu0 %887  ;;  %v914_v11 = vmul.f32 %v1960_v43, %v891_v9 }
 0x452   :  { %vm1230_vm11 = vcmp.eq.f32.partialorder %v1227_v46, %v1229_v63  ;;  %v903_v2 = vmax.f32 %v888_v1, 1e-12  ;;  %v1235_v31 = vcvt.f32.s32 %v1229_v63 }
 0x453   :  { %v1231_v0 = vsel %vm1230_vm11, %v1226_v52, inf }
 0x454   :  { %1232 = vmin.xlane.f32.xlu1 %v1231_v0  ;;  %1738 = vrsqrt.f32 %v903_v2  ;;  %vm910_vm13 = vweird.f32 %v903_v2  ;;  %v1236_v57 = vshll.u32 %v1235_v31, 16 }
 0x45a   :  { %v1739_v3 = vpop.eup %1738 }
 0x45b   :  { %v905_v4 = vmul.f32 %v1739_v3, %v903_v2  ;;  %vm911_vm12 = vweird.f32 %v1739_v3 }
 0x45c   :  { %vm912_vm14 = vmor %vm910_vm13, %vm911_vm12 }
 0x45d   :  { %v906_v5 = vmul.f32 %v1739_v3, %v905_v4 }
 0x45f   :  { %v907_v6 = vmul.f32 0.5, %v906_v5 }
 0x461   :  { %v908_v7 = vsub.f32 1.5, %v907_v6 }
 0x463   :  { %v909_v8 = vmul.f32 %v1739_v3, %v908_v7 }
 0x465   :  { %v913_v10 = vsel %vm912_vm14, %v1739_v3, %v909_v8 }
 0x466   :  { %v915_v12 = vmul.f32 %v914_v11, %v913_v10 }
 0x468   :  { %vm1041_vm15 = vcmp.lt.f32.partialorder %v915_v12, 0.3  ;;  %v1045_v21 = vsel %vm1044_vm0, %v915_v12, 0.0 }
 0x469   :  { %v1613_v22 = vsel %vm1041_vm15, 1.0, %v1909_v61  ;;  %v1239_v61 = vcvt.s32.f32 %v1622_v27 }
 0x46a   :  { %v1105_v30 = vmul.f32 %v1613_v22, %v1104_v24  ;;  %v1172_v34 = vmul.f32 %v1613_v22, %v1171_v53 }
 0x46b   :  { %v1240_v39 = vmul.f32 %v1613_v22, %v1239_v61 }
 0x46c   :  { %v1109_v28 = vsel %vm1108_vm1, %v1105_v30, %v1045_v21 }
 0x4be   :  { %v1165_v15 = vpop.xlane.xlu0 %1164 }
 0x4bf   :  { %v1166_v17 = vcvt.f32.s32 %v1165_v15  ;;  %v1099_v18 = vpop.xlane.xlu2 %1098 }
 0x4c0   :  { %v1100_v23 = vcvt.f32.s32 %v1099_v18 }
 0x4c1   :  { %v1169_v26 = vadd.s32 %v1168_v16, %v1166_v17 }
 0x4c2   :  { %v1103_v43 = vadd.s32 %v1102_v19, %v1100_v23 }
 0x4c3   :  { %v1619_v29 = vadd.s32 4294967232, %v1169_v26 }
 0x4c4   :  { %v1106_v51 = vcvt.s32.f32 %v1103_v43 }
 0x4c5   :  { %v1174_v32 = vcvt.s32.f32 %v1619_v29 }
 0x4c6   :  { %v1107_v20 = vmul.f32 %v1613_v22, %v1106_v51 }
 0x4c7   :  { %v1175_v33 = vmul.f32 %v1613_v22, %v1174_v32  ;;  %v1233_v35 = vpop.xlane.xlu1 %1232 }
 0x4c8   :  { %v1111_v36 = vsel %vm1110_vm2, %v1107_v20, %v1109_v28  ;;  %v1234_v37 = vcvt.f32.s32 %v1233_v35 }
 0x4c9   :  { %v1177_v38 = vsel %vm1176_vm3, %v1172_v34, %v1111_v36 }
 0x4ca   :  { %v1237_v40 = vadd.s32 %v1236_v57, %v1234_v37  ;;  %v1179_v41 = vsel %vm1178_vm4, %v1175_v33, %v1177_v38 }
 0x4cb   :  { %v1245_v42 = vsel %vm1244_vm5, %v1240_v39, %v1179_v41 }
 0x4cc   :  { %v1623_v44 = vadd.s32 4294967168, %v1237_v40 }
 0x4ce   :  { %v1242_v45 = vcvt.s32.f32 %v1623_v44 }
 0x4d0   :  { %v1243_v46 = vmul.f32 %v1613_v22, %v1242_v45 }
 0x4d2   :  { %v1247_v47 = vsel %vm1246_vm6, %v1243_v46, %v1245_v42 }
 0x4d3   :  { %1248 = vst [vmem:[#allocation11] sm:$0xff] %v1247_v47 }
 0x4d4   :  { %1259 = dma.vmem_to_hbm [thread:$0]  %s1255_s4, 128, %s1257_s21, [#allocation4]  }
 0x4d5   :  { %1890 = dma.done.wait [#allocation4], 128  }
 0x4d6   :  { %1891 = vsyncadd [#allocation4], 4294967168 }
 0x4d7   :  { %1264 = vsyncpa [#allocation3], 1 }
 0x4d8   :  { %1265 = vsyncpa [#allocation6], 1 }
 0x4d9   :  { %1266 = vsyncpa [#allocation9], 1 }
 0x4da   :  { %1267 = vsyncpa [#allocation4], 1 }

</bundles_post_ra>
